<compile_context>
chip_gen: v5e
topology: v5e:2x2
jax: 0.10.0
libtpu: 0.0.40
codegen_flags: <defaults>
</compile_context>

<pallas_src>
import functools

import numpy as np
import jax
import jax.numpy as jnp
from jax.experimental import pallas as pl
from jax.experimental.pallas import tpu as pltpu

N_HEADS = 6
EPS = 1e-5          # torch GroupNorm default eps
MAX_TM = 128        # query-row tile size cap


def _round_up(v, m):
    return ((v + m - 1) // m) * m


def _gn(x, gamma, beta):
    """GroupNorm(num_groups=1) on [R, F]: per-row normalization, single-pass stats."""
    f = x.shape[-1]
    s1 = jnp.sum(x, axis=-1, keepdims=True)
    s2 = jnp.sum(x * x, axis=-1, keepdims=True)
    mean = s1 * (1.0 / f)
    var = jnp.maximum(s2 * (1.0 / f) - mean * mean, 0.0)
    return (x - mean) * jax.lax.rsqrt(var + EPS) * gamma + beta


def _full_spec(shape):
    n = len(shape)
    return pl.BlockSpec(shape, lambda *_: (0,) * n)


def _compiler_params(vmem_need):
    kwargs = dict(dimension_semantics=("parallel",))
    if vmem_need > (16 << 20):   # raise scoped VMEM only when the working set needs it
        kwargs["vmem_limit_bytes"] = int(min(max(2 * vmem_need, 32 << 20), 48 << 20))
    return pltpu.CompilerParams(**kwargs)


def _proj_vmem_bytes(TM, N_pad, C, H):
    weights = 3 * C * H * C * 2 + H * C * C * 2 + 6 * H * C * 4
    tiles = 2 * (TM * C * 4 + 3 * H * TM * C * 2)          # double-buffered in/out tiles
    work = 4 * TM * H * C * 4
    return weights + tiles + work


def _att_vmem_bytes(TM, N_pad, C, H):
    resident = 2 * H * N_pad * C * 2 + 5 * N_pad * 4       # k, vp (bf16) + geometry rows
    weights = 3 * C * C * 4 + 6 * C * 4
    tiles = 2 * (TM * C * 4 + H * TM * C * 2 + TM * 4 * 4 + TM * 4 + TM * C * 4)
    work = 3 * H * TM * N_pad * 4                           # scores / gates / per-head out
    return resident + weights + tiles + work


# --------------------------- phase A: q / k / (v @ Wo1) projections ---------------------------
def proj_kernel(x_ref, wq_ref, gq_ref, bq_ref, wk_ref, gk_ref, bk_ref,
                wv_ref, gv_ref, bv_ref, wo1_ref, q_out, k_out, vp_out,
                *, n_ctx, n_heads):
    C = n_ctx
    x = x_ref[...].astype(jnp.bfloat16)                                   # [TM, C]
    q = jax.nn.relu(_gn(jnp.dot(x, wq_ref[...], preferred_element_type=jnp.float32),
                        gq_ref[...], bq_ref[...])) * (C ** -0.5)          # scale folded into q
    k = jax.nn.relu(_gn(jnp.dot(x, wk_ref[...], preferred_element_type=jnp.float32),
                        gk_ref[...], bk_ref[...]))
    v = jax.nn.relu(_gn(jnp.dot(x, wv_ref[...], preferred_element_type=jnp.float32),
                        gv_ref[...], bv_ref[...]))                        # to_v has act=True
    # head-major layout so phase B never lane-slices 32-wide windows out of 192-wide rows
    for h in range(n_heads):
        sl = slice(h * C, (h + 1) * C)
        q_out[h, :, :] = q[:, sl].astype(jnp.bfloat16)
        k_out[h, :, :] = k[:, sl].astype(jnp.bfloat16)
        # fold the first to_out Linear:  vp[h] = v_h @ Wo1_h   (associativity of the gating sum)
        vp_out[h, :, :] = jnp.dot(v[:, sl].astype(jnp.bfloat16), wo1_ref[h, :, :],
                                  preferred_element_type=jnp.float32).astype(jnp.bfloat16)


# --------------------------- phase B: masked gated attention + tail ---------------------------
def att_kernel(x_ref, q_ref, k_ref, vp_ref, geoq_ref, geoc_ref, bq_ref, bc_ref,
               wagt_ref, go1_ref, bo1_ref, wo2_ref, gng_ref, gnb_ref,
               wlin_ref, gl_ref, bl_ref, out_ref, *, dist_th):
    # pairwise geometry for this query tile (dist Linear precomputed per agent in the wrapper)
    gq = geoq_ref[...]                                    # [TM, 4]  (cx, cy, w.ctr + b, 0)
    gc = geoc_ref[...]                                    # [4, N]   (cx, cy, w.ctr, 0)
    dx = gq[:, 0:1] - gc[0:1, :]                          # [TM, N]
    dy = gq[:, 1:2] - gc[1:2, :]
    dlin = gq[:, 2:3] - gc[2:3, :]                        # == dist Linear((ctr_a - ctr_c))
    dist2 = dx * dx + dy * dy
    valid = jnp.logical_and(bq_ref[...] == bc_ref[...],   # int32 batch-id compare
                            dist2 <= dist_th * dist_th)   # [TM, N] bool

    # batched per-head scores: one dot_general over the head axis
    q = q_ref[...]                                        # [H, TM, C] bf16 (pre-scaled)
    k = k_ref[...]                                        # [H, N,  C] bf16
    s = jax.lax.dot_general(q, k, (((2,), (2,)), ((0,), (0,))),
                            preferred_element_type=jnp.float32)       # [H, TM, N]
    s = s + dlin[None, :, :]
    g = jnp.where(valid[None, :, :], jax.nn.sigmoid(s), 0.0)          # masked gates == index_add

    # gated aggregation, Wo1 already folded into vp
    o = jax.lax.dot_general(g.astype(jnp.bfloat16), vp_ref[...],
                            (((2,), (1,)), ((0,), (0,))),
                            preferred_element_type=jnp.float32)       # [H, TM, C]
    o_pre = jnp.sum(o, axis=0)                                        # [TM, C] == out @ Wo1

    # to_out tail:  GN + relu, then Linear(C -> C, no bias)
    o = jax.nn.relu(_gn(o_pre, go1_ref[...], bo1_ref[...]))
    o = jnp.dot(o, wo2_ref[...], preferred_element_type=jnp.float32)

    # residual / norm tail (tiny CxC matmuls kept f32 for accuracy)
    x = x_ref[...]                                                    # [TM, C] f32
    a = jnp.dot(x, wagt_ref[...], preferred_element_type=jnp.float32) + o
    a = jax.nn.relu(_gn(a, gng_ref[...], gnb_ref[...]))
    a = _gn(jnp.dot(a, wlin_ref[...], preferred_element_type=jnp.float32),
            gl_ref[...], bl_ref[...])
    out_ref[...] = jax.nn.relu(a + x)


# ----------------------------------------- wrapper --------------------------------------------
def att_forward(x, ctrs, batch_idx, p, dist_th):
    N, C = x.shape
    H = N_HEADS
    TM = min(MAX_TM, _round_up(max(N, 8), 8))
    N_pad = _round_up(N, TM)
    pad = N_pad - N

    xf = jnp.pad(x, ((0, pad), (0, 0))) if pad else x
    ctrs_p = jnp.pad(ctrs, ((0, pad), (0, 0))) if pad else ctrs
    bidx = batch_idx.astype(jnp.int32)
    if pad:
        bidx = jnp.pad(bidx, ((0, pad),), constant_values=-1)  # padded rows never match a batch

    bf16 = lambda a: a.astype(jnp.bfloat16)
    wq, wk, wv = bf16(p['wq']), bf16(p['wk']), bf16(p['wv'])
    wo1_hm = bf16(p['wo1'].reshape(H, C, C))                    # head-major [H, C, C]

    grid = (N_pad // TM,)

    # ---- phase A ----
    cost_a = pl.CostEstimate(
        flops=int(2 * N_pad * C * 4 * H * C),
        transcendentals=int(3 * N_pad),
        bytes_accessed=int(N_pad * C * 4 + 4 * C * H * C * 2 + 3 * H * N_pad * C * 2))
    q_hm, k_hm, vp_hm = pl.pallas_call(
        functools.partial(proj_kernel, n_ctx=C, n_heads=H),
        out_shape=(jax.ShapeDtypeStruct((H, N_pad, C), jnp.bfloat16),
                   jax.ShapeDtypeStruct((H, N_pad, C), jnp.bfloat16),
                   jax.ShapeDtypeStruct((H, N_pad, C), jnp.bfloat16)),
        grid=grid,
        in_specs=[pl.BlockSpec((TM, C), lambda i: (i, 0)),
                  _full_spec((C, H * C)), _full_spec((1, H * C)), _full_spec((1, H * C)),
                  _full_spec((C, H * C)), _full_spec((1, H * C)), _full_spec((1, H * C)),
                  _full_spec((C, H * C)), _full_spec((1, H * C)), _full_spec((1, H * C)),
                  _full_spec((H, C, C))],
        out_specs=(pl.BlockSpec((H, TM, C), lambda i: (0, i, 0)),
                   pl.BlockSpec((H, TM, C), lambda i: (0, i, 0)),
                   pl.BlockSpec((H, TM, C), lambda i: (0, i, 0))),
        compiler_params=_compiler_params(_proj_vmem_bytes(TM, N_pad, C, H)),
        cost_estimate=cost_a,
    )(xf, wq, p['gq'], p['bq'], wk, p['gk'], p['bk'], wv, p['gv'], p['bv'], wo1_hm)

    # ---- packed geometry (dist Linear precomputed per agent) ----
    w0 = p['dist_w'][0]
    w1 = p['dist_w'][1]
    db = p['dist_b'][0]
    cx = ctrs_p[:, 0]
    cy = ctrs_p[:, 1]
    pvec = cx * w0 + cy * w1
    zeros = jnp.zeros_like(pvec)
    geo_q = jnp.stack([cx, cy, pvec + db, zeros], axis=1).astype(jnp.float32)   # [N_pad, 4]
    geo_c = jnp.stack([cx, cy, pvec, zeros], axis=0).astype(jnp.float32)        # [4, N_pad]
    bidx_col = bidx.reshape(N_pad, 1)
    bidx_row = bidx.reshape(1, N_pad)

    # ---- phase B ----
    # TODO(synk): for very large N the context axis could also be tiled flash-style; here only
    # the query axis is tiled, so k/vp/[TM,N] gates stay resident per step.
    cost_b = pl.CostEstimate(
        flops=int(4 * H * N_pad * N_pad * C + 6 * N_pad * C * C),
        transcendentals=int(H * N_pad * N_pad + 4 * N_pad),
        bytes_accessed=int(2 * N_pad * C * 4 + 3 * H * N_pad * C * 2 + 6 * N_pad * 4))
    out = pl.pallas_call(
        functools.partial(att_kernel, dist_th=float(dist_th)),
        out_shape=jax.ShapeDtypeStruct((N_pad, C), jnp.float32),
        grid=grid,
        in_specs=[
            pl.BlockSpec((TM, C), lambda i: (i, 0)),          # x tile
            pl.BlockSpec((H, TM, C), lambda i: (0, i, 0)),    # q tile (head-major)
            _full_spec((H, N_pad, C)),                        # k   (resident)
            _full_spec((H, N_pad, C)),                        # vp  (resident)
            pl.BlockSpec((TM, 4), lambda i: (i, 0)),          # geo_q tile
            _full_spec((4, N_pad)),                           # geo_c
            pl.BlockSpec((TM, 1), lambda i: (i, 0)),          # batch id (query)
            _full_spec((1, N_pad)),                           # batch id (context)
            _full_spec((C, C)), _full_spec((1, C)), _full_spec((1, C)),   # wagt, go1, bo1
            _full_spec((C, C)), _full_spec((1, C)), _full_spec((1, C)),   # wo2, gn_g, gn_b
            _full_spec((C, C)), _full_spec((1, C)), _full_spec((1, C)),   # wlin, gl, bl
        ],
        out_specs=pl.BlockSpec((TM, C), lambda i: (i, 0)),
        compiler_params=_compiler_params(_att_vmem_bytes(TM, N_pad, C, H)),
        cost_estimate=cost_b,
    )(xf, q_hm, k_hm, vp_hm, geo_q, geo_c, bidx_col, bidx_row,
      p['wagt'], p['go1'], p['bo1'], p['wo2'], p['gn_g'], p['gn_b'],
      p['wlin'], p['gl'], p['bl'])
    return out[:N] if pad else out


def a2a_forward(agents, ctrs, batch_idx, params_list, dist_th):
    for p in params_list:
        agents = att_forward(agents, ctrs, batch_idx, p, dist_th)
    return agents


def init_att_params(key, C):
    H = N_HEADS
    keys = jax.random.split(key, 20)
    r = lambda k, shp, s=0.1: jax.random.normal(k, shp, dtype=jnp.float32) * s
    return {
        'dist_w': r(keys[0], (2,)),
        'dist_b': r(keys[1], (1,)),
        'wq': r(keys[2], (C, H * C)), 'gq': 1.0 + r(keys[3], (1, H * C)), 'bq': r(keys[4], (1, H * C)),
        'wk': r(keys[5], (C, H * C)), 'gk': 1.0 + r(keys[6], (1, H * C)), 'bk': r(keys[7], (1, H * C)),
        'wv': r(keys[8], (C, H * C)), 'gv': 1.0 + r(keys[9], (1, H * C)), 'bv': r(keys[10], (1, H * C)),
        'wo1': r(keys[11], (H * C, C)), 'go1': 1.0 + r(keys[12], (1, C)), 'bo1': r(keys[13], (1, C)),
        'wo2': r(keys[14], (C, C)),
        'wagt': r(keys[15], (C, C)),
        'gn_g': 1.0 + r(keys[16], (1, C)), 'gn_b': r(keys[17], (1, C)),
        'wlin': r(keys[18], (C, C)),
        'gl': 1.0 + r(keys[19], (1, C)), 'bl': jnp.zeros((1, C), jnp.float32),
    }


# ----------------------- numpy reference (mirrors the PyTorch sparse path) -----------------------
def _relu(x): return np.maximum(x, 0.0)
def _sigmoid(x): return 1.0 / (1.0 + np.exp(-x))


def _gn_np(x, g, b):
    m = x.mean(-1, keepdims=True)
    v = ((x - m) ** 2).mean(-1, keepdims=True)
    return (x - m) / np.sqrt(v + EPS) * g + b


def ref_att(x, ctrs, counts, p, dist_th):
    p = {kk: np.asarray(vv, np.float32) for kk, vv in p.items()}
    N, C = x.shape
    H = N_HEADS
    scale = C ** (-0.5)
    res = x
    starts = np.concatenate([[0], np.cumsum(counts)]).astype(int)
    hi, wi = [], []
    hc = wc = 0
    for i in range(len(counts)):
        a = ctrs[starts[i]:starts[i + 1]]
        d = np.sqrt(((a[:, None, :] - a[None, :, :]) ** 2).sum(-1))
        ids = np.argwhere(d <= dist_th)
        if len(ids) == 0:
            continue
        hi.append(ids[:, 0] + hc)
        wi.append(ids[:, 1] + wc)
        hc += counts[i]
        wc += counts[i]
    hi = np.concatenate(hi)
    wi = np.concatenate(wi)
    dvec = (ctrs[hi] - ctrs[wi]) @ p['dist_w'].reshape(2, 1) + p['dist_b']          # [E,1]
    q = _relu(_gn_np(x[hi] @ p['wq'], p['gq'], p['bq']))
    k = _relu(_gn_np(x[wi] @ p['wk'], p['gk'], p['bk']))
    v = _relu(_gn_np(x[wi] @ p['wv'], p['gv'], p['bv']))
    E = len(hi)
    qh, kh, vh = (t.reshape(E, H, C) for t in (q, k, v))
    gates = _sigmoid((qh * kh).sum(-1) * scale + dvec)                               # [E,H]
    out = np.zeros((N, H, C), np.float32)
    np.add.at(out, hi, gates[:, :, None] * vh)
    out = out.reshape(N, H * C)
    o = _relu(_gn_np(out @ p['wo1'], p['go1'], p['bo1'])) @ p['wo2']
    a = x @ p['wagt'] + o
    a = _relu(_gn_np(a, p['gn_g'], p['gn_b']))
    a = _gn_np(a @ p['wlin'], p['gl'], p['bl'])
    return _relu(a + res)


if __name__ == "__main__":
    key = jax.random.PRNGKey(0)
    C = 32                      # n_agent
    counts = [8, 8]             # agents per batch element
    N = sum(counts)
    dist_th = 4.0               # config['agent2agent_dist']

    k1, k2, k3, k4 = jax.random.split(key, 4)
    agents = jax.random.normal(k1, (N, C), jnp.float32)
    agent_ctrs = [jax.random.uniform(k2, (counts[0], 2), jnp.float32, 0.0, 10.0),
                  jax.random.uniform(k3, (counts[1], 2), jnp.float32, 0.0, 10.0)]

    params_list = [init_att_params(kk, C) for kk in jax.random.split(k4, 2)]  # 2 Att layers

    ctrs = jnp.concatenate(agent_ctrs, axis=0)
    batch_idx = jnp.concatenate(
        [jnp.full((c,), i, jnp.int32) for i, c in enumerate(counts)])

    out = a2a_forward(agents, ctrs, batch_idx, params_list, dist_th)
    out = jax.block_until_ready(out)

    # correctness check against a numpy reference that follows the PyTorch sparse edge path
    # (kernel uses bf16 MXU operands, so allow a correspondingly loose tolerance)
    ref = np.asarray(agents, np.float32)
    ctrs_np = np.asarray(ctrs, np.float32)
    for p in params_list:
        ref = ref_att(ref, ctrs_np, counts, p, dist_th)
    err = float(np.max(np.abs(np.asarray(out) - ref)))
    assert err < 1.5e-1, f"max abs diff too large: {err}"

    print("KERNEL_OK")
</pallas_src>

<mosaic_0001>
module attributes {stable_mosaic.version = 11 : i64} {
  func.func @proj_kernel(%arg0: i32, %arg1: memref<16x32xf32, #tpu.memory_space<vmem>>, %arg2: memref<32x192xbf16, #tpu.memory_space<vmem>>, %arg3: memref<1x192xf32, #tpu.memory_space<vmem>>, %arg4: memref<1x192xf32, #tpu.memory_space<vmem>>, %arg5: memref<32x192xbf16, #tpu.memory_space<vmem>>, %arg6: memref<1x192xf32, #tpu.memory_space<vmem>>, %arg7: memref<1x192xf32, #tpu.memory_space<vmem>>, %arg8: memref<32x192xbf16, #tpu.memory_space<vmem>>, %arg9: memref<1x192xf32, #tpu.memory_space<vmem>>, %arg10: memref<1x192xf32, #tpu.memory_space<vmem>>, %arg11: memref<6x32x32xbf16, #tpu.memory_space<vmem>>, %arg12: memref<6x16x32xbf16, #tpu.memory_space<vmem>>, %arg13: memref<6x16x32xbf16, #tpu.memory_space<vmem>>, %arg14: memref<6x16x32xbf16, #tpu.memory_space<vmem>>) attributes {dimension_semantics = [#tpu.dimension_semantics<parallel>], iteration_bounds = array<i64: 1>, scalar_prefetch = 0 : i64, scratch_operands = 0 : i64, tpu.core_type = #tpu.core_type<tc>, window_params = [{transform_indices = @transform_0, window_bounds = array<i64: 16, 32>}, {pipeline_mode = #tpu.pipeline_mode<synchronous>, transform_indices = @transform_1, window_bounds = array<i64: 32, 192>}, {pipeline_mode = #tpu.pipeline_mode<synchronous>, transform_indices = @transform_2, window_bounds = array<i64: 1, 192>}, {pipeline_mode = #tpu.pipeline_mode<synchronous>, transform_indices = @transform_3, window_bounds = array<i64: 1, 192>}, {pipeline_mode = #tpu.pipeline_mode<synchronous>, transform_indices = @transform_4, window_bounds = array<i64: 32, 192>}, {pipeline_mode = #tpu.pipeline_mode<synchronous>, transform_indices = @transform_5, window_bounds = array<i64: 1, 192>}, {pipeline_mode = #tpu.pipeline_mode<synchronous>, transform_indices = @transform_6, window_bounds = array<i64: 1, 192>}, {pipeline_mode = #tpu.pipeline_mode<synchronous>, transform_indices = @transform_7, window_bounds = array<i64: 32, 192>}, {pipeline_mode = #tpu.pipeline_mode<synchronous>, transform_indices = @transform_8, window_bounds = array<i64: 1, 192>}, {pipeline_mode = #tpu.pipeline_mode<synchronous>, transform_indices = @transform_9, window_bounds = array<i64: 1, 192>}, {pipeline_mode = #tpu.pipeline_mode<synchronous>, transform_indices = @transform_10, window_bounds = array<i64: 6, 32, 32>}, {transform_indices = @transform_11, window_bounds = array<i64: 6, 16, 32>}, {transform_indices = @transform_12, window_bounds = array<i64: 6, 16, 32>}, {transform_indices = @transform_13, window_bounds = array<i64: 6, 16, 32>}]} {
    %c0 = arith.constant 0 : index
    %c0_0 = arith.constant 0 : index
    %0 = vector.load %arg1[%c0, %c0_0] : memref<16x32xf32, #tpu.memory_space<vmem>>, vector<16x32xf32>
    %1 = arith.truncf %0 : vector<16x32xf32> to vector<16x32xbf16>
    %c0_1 = arith.constant 0 : index
    %c0_2 = arith.constant 0 : index
    %2 = vector.load %arg2[%c0_1, %c0_2] : memref<32x192xbf16, #tpu.memory_space<vmem>>, vector<32x192xbf16>
    %cst = arith.constant dense<0.000000e+00> : vector<16x192xf32>
    %3 = tpu.matmul %1, %2, %cst {dimension_numbers = #tpu.dot_dimension_numbers<[1], [0], [0], [1], [0, 0, 1, 1], [], []>} : vector<16x32xbf16>, vector<32x192xbf16>, vector<16x192xf32> -> vector<16x192xf32>
    %c0_3 = arith.constant 0 : index
    %c0_4 = arith.constant 0 : index
    %4 = vector.load %arg3[%c0_3, %c0_4] : memref<1x192xf32, #tpu.memory_space<vmem>>, vector<1x192xf32>
    %c0_5 = arith.constant 0 : index
    %c0_6 = arith.constant 0 : index
    %5 = vector.load %arg4[%c0_5, %c0_6] : memref<1x192xf32, #tpu.memory_space<vmem>>, vector<1x192xf32>
    %cst_7 = arith.constant dense<0.000000e+00> : vector<16xf32>
    %6 = vector.multi_reduction <add>, %3, %cst_7 [1] : vector<16x192xf32> to vector<16xf32>
    %7 = vector.shape_cast %6 : vector<16xf32> to vector<16x1xf32>
    %8 = arith.mulf %3, %3 : vector<16x192xf32>
    %cst_8 = arith.constant dense<0.000000e+00> : vector<16xf32>
    %9 = vector.multi_reduction <add>, %8, %cst_8 [1] : vector<16x192xf32> to vector<16xf32>
    %10 = vector.shape_cast %9 : vector<16xf32> to vector<16x1xf32>
    %cst_9 = arith.constant 0.00520833349 : f32
    %11 = vector.broadcast %cst_9 : f32 to vector<16x1xf32>
    %12 = arith.mulf %7, %11 : vector<16x1xf32>
    %cst_10 = arith.constant 0.00520833349 : f32
    %13 = vector.broadcast %cst_10 : f32 to vector<16x1xf32>
    %14 = arith.mulf %10, %13 : vector<16x1xf32>
    %15 = arith.mulf %12, %12 : vector<16x1xf32>
    %16 = arith.subf %14, %15 : vector<16x1xf32>
    %cst_11 = arith.constant 0.000000e+00 : f32
    %17 = vector.broadcast %cst_11 : f32 to vector<16x1xf32>
    %18 = arith.maximumf %16, %17 : vector<16x1xf32>
    %19 = vector.broadcast %12 : vector<16x1xf32> to vector<16x192xf32>
    %20 = arith.subf %3, %19 : vector<16x192xf32>
    %cst_12 = arith.constant 9.99999974E-6 : f32
    %21 = vector.broadcast %cst_12 : f32 to vector<16x1xf32>
    %22 = arith.addf %18, %21 : vector<16x1xf32>
    %23 = math.rsqrt %22 : vector<16x1xf32>
    %24 = vector.broadcast %23 : vector<16x1xf32> to vector<16x192xf32>
    %25 = arith.mulf %20, %24 : vector<16x192xf32>
    %26 = vector.broadcast %4 : vector<1x192xf32> to vector<16x192xf32>
    %27 = arith.mulf %25, %26 : vector<16x192xf32>
    %28 = vector.broadcast %5 : vector<1x192xf32> to vector<16x192xf32>
    %29 = arith.addf %27, %28 : vector<16x192xf32>
    %cst_13 = arith.constant 0.000000e+00 : f32
    %30 = vector.broadcast %cst_13 : f32 to vector<16x192xf32>
    %31 = arith.maximumf %29, %30 : vector<16x192xf32>
    %cst_14 = arith.constant 0.176776692 : f32
    %32 = vector.broadcast %cst_14 : f32 to vector<16x192xf32>
    %33 = arith.mulf %31, %32 : vector<16x192xf32>
    %c0_15 = arith.constant 0 : index
    %c0_16 = arith.constant 0 : index
    %34 = vector.load %arg5[%c0_15, %c0_16] : memref<32x192xbf16, #tpu.memory_space<vmem>>, vector<32x192xbf16>
    %cst_17 = arith.constant dense<0.000000e+00> : vector<16x192xf32>
    %35 = tpu.matmul %1, %34, %cst_17 {dimension_numbers = #tpu.dot_dimension_numbers<[1], [0], [0], [1], [0, 0, 1, 1], [], []>} : vector<16x32xbf16>, vector<32x192xbf16>, vector<16x192xf32> -> vector<16x192xf32>
    %c0_18 = arith.constant 0 : index
    %c0_19 = arith.constant 0 : index
    %36 = vector.load %arg6[%c0_18, %c0_19] : memref<1x192xf32, #tpu.memory_space<vmem>>, vector<1x192xf32>
    %c0_20 = arith.constant 0 : index
    %c0_21 = arith.constant 0 : index
    %37 = vector.load %arg7[%c0_20, %c0_21] : memref<1x192xf32, #tpu.memory_space<vmem>>, vector<1x192xf32>
    %cst_22 = arith.constant dense<0.000000e+00> : vector<16xf32>
    %38 = vector.multi_reduction <add>, %35, %cst_22 [1] : vector<16x192xf32> to vector<16xf32>
    %39 = vector.shape_cast %38 : vector<16xf32> to vector<16x1xf32>
    %40 = arith.mulf %35, %35 : vector<16x192xf32>
    %cst_23 = arith.constant dense<0.000000e+00> : vector<16xf32>
    %41 = vector.multi_reduction <add>, %40, %cst_23 [1] : vector<16x192xf32> to vector<16xf32>
    %42 = vector.shape_cast %41 : vector<16xf32> to vector<16x1xf32>
    %cst_24 = arith.constant 0.00520833349 : f32
    %43 = vector.broadcast %cst_24 : f32 to vector<16x1xf32>
    %44 = arith.mulf %39, %43 : vector<16x1xf32>
    %cst_25 = arith.constant 0.00520833349 : f32
    %45 = vector.broadcast %cst_25 : f32 to vector<16x1xf32>
    %46 = arith.mulf %42, %45 : vector<16x1xf32>
    %47 = arith.mulf %44, %44 : vector<16x1xf32>
    %48 = arith.subf %46, %47 : vector<16x1xf32>
    %cst_26 = arith.constant 0.000000e+00 : f32
    %49 = vector.broadcast %cst_26 : f32 to vector<16x1xf32>
    %50 = arith.maximumf %48, %49 : vector<16x1xf32>
    %51 = vector.broadcast %44 : vector<16x1xf32> to vector<16x192xf32>
    %52 = arith.subf %35, %51 : vector<16x192xf32>
    %cst_27 = arith.constant 9.99999974E-6 : f32
    %53 = vector.broadcast %cst_27 : f32 to vector<16x1xf32>
    %54 = arith.addf %50, %53 : vector<16x1xf32>
    %55 = math.rsqrt %54 : vector<16x1xf32>
    %56 = vector.broadcast %55 : vector<16x1xf32> to vector<16x192xf32>
    %57 = arith.mulf %52, %56 : vector<16x192xf32>
    %58 = vector.broadcast %36 : vector<1x192xf32> to vector<16x192xf32>
    %59 = arith.mulf %57, %58 : vector<16x192xf32>
    %60 = vector.broadcast %37 : vector<1x192xf32> to vector<16x192xf32>
    %61 = arith.addf %59, %60 : vector<16x192xf32>
    %cst_28 = arith.constant 0.000000e+00 : f32
    %62 = vector.broadcast %cst_28 : f32 to vector<16x192xf32>
    %63 = arith.maximumf %61, %62 : vector<16x192xf32>
    %c0_29 = arith.constant 0 : index
    %c0_30 = arith.constant 0 : index
    %64 = vector.load %arg8[%c0_29, %c0_30] : memref<32x192xbf16, #tpu.memory_space<vmem>>, vector<32x192xbf16>
    %cst_31 = arith.constant dense<0.000000e+00> : vector<16x192xf32>
    %65 = tpu.matmul %1, %64, %cst_31 {dimension_numbers = #tpu.dot_dimension_numbers<[1], [0], [0], [1], [0, 0, 1, 1], [], []>} : vector<16x32xbf16>, vector<32x192xbf16>, vector<16x192xf32> -> vector<16x192xf32>
    %c0_32 = arith.constant 0 : index
    %c0_33 = arith.constant 0 : index
    %66 = vector.load %arg9[%c0_32, %c0_33] : memref<1x192xf32, #tpu.memory_space<vmem>>, vector<1x192xf32>
    %c0_34 = arith.constant 0 : index
    %c0_35 = arith.constant 0 : index
    %67 = vector.load %arg10[%c0_34, %c0_35] : memref<1x192xf32, #tpu.memory_space<vmem>>, vector<1x192xf32>
    %cst_36 = arith.constant dense<0.000000e+00> : vector<16xf32>
    %68 = vector.multi_reduction <add>, %65, %cst_36 [1] : vector<16x192xf32> to vector<16xf32>
    %69 = vector.shape_cast %68 : vector<16xf32> to vector<16x1xf32>
    %70 = arith.mulf %65, %65 : vector<16x192xf32>
    %cst_37 = arith.constant dense<0.000000e+00> : vector<16xf32>
    %71 = vector.multi_reduction <add>, %70, %cst_37 [1] : vector<16x192xf32> to vector<16xf32>
    %72 = vector.shape_cast %71 : vector<16xf32> to vector<16x1xf32>
    %cst_38 = arith.constant 0.00520833349 : f32
    %73 = vector.broadcast %cst_38 : f32 to vector<16x1xf32>
    %74 = arith.mulf %69, %73 : vector<16x1xf32>
    %cst_39 = arith.constant 0.00520833349 : f32
    %75 = vector.broadcast %cst_39 : f32 to vector<16x1xf32>
    %76 = arith.mulf %72, %75 : vector<16x1xf32>
    %77 = arith.mulf %74, %74 : vector<16x1xf32>
    %78 = arith.subf %76, %77 : vector<16x1xf32>
    %cst_40 = arith.constant 0.000000e+00 : f32
    %79 = vector.broadcast %cst_40 : f32 to vector<16x1xf32>
    %80 = arith.maximumf %78, %79 : vector<16x1xf32>
    %81 = vector.broadcast %74 : vector<16x1xf32> to vector<16x192xf32>
    %82 = arith.subf %65, %81 : vector<16x192xf32>
    %cst_41 = arith.constant 9.99999974E-6 : f32
    %83 = vector.broadcast %cst_41 : f32 to vector<16x1xf32>
    %84 = arith.addf %80, %83 : vector<16x1xf32>
    %85 = math.rsqrt %84 : vector<16x1xf32>
    %86 = vector.broadcast %85 : vector<16x1xf32> to vector<16x192xf32>
    %87 = arith.mulf %82, %86 : vector<16x192xf32>
    %88 = vector.broadcast %66 : vector<1x192xf32> to vector<16x192xf32>
    %89 = arith.mulf %87, %88 : vector<16x192xf32>
    %90 = vector.broadcast %67 : vector<1x192xf32> to vector<16x192xf32>
    %91 = arith.addf %89, %90 : vector<16x192xf32>
    %cst_42 = arith.constant 0.000000e+00 : f32
    %92 = vector.broadcast %cst_42 : f32 to vector<16x192xf32>
    %93 = arith.maximumf %91, %92 : vector<16x192xf32>
    %94 = vector.extract_strided_slice %33 {offsets = [0, 0], sizes = [16, 32], strides = [1, 1]} : vector<16x192xf32> to vector<16x32xf32>
    %95 = arith.truncf %94 : vector<16x32xf32> to vector<16x32xbf16>
    %c0_43 = arith.constant 0 : index
    %c0_44 = arith.constant 0 : index
    %c0_45 = arith.constant 0 : index
    %96 = vector.load %arg12[%c0_43, %c0_44, %c0_45] : memref<6x16x32xbf16, #tpu.memory_space<vmem>>, vector<1x16x32xbf16>
    %97 = vector.shape_cast %96 : vector<1x16x32xbf16> to vector<16x32xbf16>
    %98 = vector.shape_cast %95 : vector<16x32xbf16> to vector<1x16x32xbf16>
    tpu.vector_store %arg12[%c0_43, %c0_44, %c0_45], %98 {strides = array<i32>} : memref<6x16x32xbf16, #tpu.memory_space<vmem>>, vector<1x16x32xbf16>,
    %99 = vector.extract_strided_slice %63 {offsets = [0, 0], sizes = [16, 32], strides = [1, 1]} : vector<16x192xf32> to vector<16x32xf32>
    %100 = arith.truncf %99 : vector<16x32xf32> to vector<16x32xbf16>
    %c0_46 = arith.constant 0 : index
    %c0_47 = arith.constant 0 : index
    %c0_48 = arith.constant 0 : index
    %101 = vector.load %arg13[%c0_46, %c0_47, %c0_48] : memref<6x16x32xbf16, #tpu.memory_space<vmem>>, vector<1x16x32xbf16>
    %102 = vector.shape_cast %101 : vector<1x16x32xbf16> to vector<16x32xbf16>
    %103 = vector.shape_cast %100 : vector<16x32xbf16> to vector<1x16x32xbf16>
    tpu.vector_store %arg13[%c0_46, %c0_47, %c0_48], %103 {strides = array<i32>} : memref<6x16x32xbf16, #tpu.memory_space<vmem>>, vector<1x16x32xbf16>,
    %104 = vector.extract_strided_slice %93 {offsets = [0, 0], sizes = [16, 32], strides = [1, 1]} : vector<16x192xf32> to vector<16x32xf32>
    %105 = arith.truncf %104 : vector<16x32xf32> to vector<16x32xbf16>
    %c0_49 = arith.constant 0 : index
    %c0_50 = arith.constant 0 : index
    %c0_51 = arith.constant 0 : index
    %106 = vector.load %arg11[%c0_49, %c0_50, %c0_51] : memref<6x32x32xbf16, #tpu.memory_space<vmem>>, vector<1x32x32xbf16>
    %107 = vector.shape_cast %106 : vector<1x32x32xbf16> to vector<32x32xbf16>
    %cst_52 = arith.constant dense<0.000000e+00> : vector<16x32xf32>
    %108 = tpu.matmul %105, %107, %cst_52 {dimension_numbers = #tpu.dot_dimension_numbers<[1], [0], [0], [1], [0, 0, 1, 1], [], []>} : vector<16x32xbf16>, vector<32x32xbf16>, vector<16x32xf32> -> vector<16x32xf32>
    %109 = arith.truncf %108 : vector<16x32xf32> to vector<16x32xbf16>
    %c0_53 = arith.constant 0 : index
    %c0_54 = arith.constant 0 : index
    %c0_55 = arith.constant 0 : index
    %110 = vector.load %arg14[%c0_53, %c0_54, %c0_55] : memref<6x16x32xbf16, #tpu.memory_space<vmem>>, vector<1x16x32xbf16>
    %111 = vector.shape_cast %110 : vector<1x16x32xbf16> to vector<16x32xbf16>
    %112 = vector.shape_cast %109 : vector<16x32xbf16> to vector<1x16x32xbf16>
    tpu.vector_store %arg14[%c0_53, %c0_54, %c0_55], %112 {strides = array<i32>} : memref<6x16x32xbf16, #tpu.memory_space<vmem>>, vector<1x16x32xbf16>,
    %113 = vector.extract_strided_slice %33 {offsets = [0, 32], sizes = [16, 32], strides = [1, 1]} : vector<16x192xf32> to vector<16x32xf32>
    %114 = arith.truncf %113 : vector<16x32xf32> to vector<16x32xbf16>
    %c1 = arith.constant 1 : index
    %c0_56 = arith.constant 0 : index
    %c0_57 = arith.constant 0 : index
    %115 = vector.load %arg12[%c1, %c0_56, %c0_57] : memref<6x16x32xbf16, #tpu.memory_space<vmem>>, vector<1x16x32xbf16>
    %116 = vector.shape_cast %115 : vector<1x16x32xbf16> to vector<16x32xbf16>
    %117 = vector.shape_cast %114 : vector<16x32xbf16> to vector<1x16x32xbf16>
    tpu.vector_store %arg12[%c1, %c0_56, %c0_57], %117 {strides = array<i32>} : memref<6x16x32xbf16, #tpu.memory_space<vmem>>, vector<1x16x32xbf16>,
    %118 = vector.extract_strided_slice %63 {offsets = [0, 32], sizes = [16, 32], strides = [1, 1]} : vector<16x192xf32> to vector<16x32xf32>
    %119 = arith.truncf %118 : vector<16x32xf32> to vector<16x32xbf16>
    %c1_58 = arith.constant 1 : index
    %c0_59 = arith.constant 0 : index
    %c0_60 = arith.constant 0 : index
    %120 = vector.load %arg13[%c1_58, %c0_59, %c0_60] : memref<6x16x32xbf16, #tpu.memory_space<vmem>>, vector<1x16x32xbf16>
    %121 = vector.shape_cast %120 : vector<1x16x32xbf16> to vector<16x32xbf16>
    %122 = vector.shape_cast %119 : vector<16x32xbf16> to vector<1x16x32xbf16>
    tpu.vector_store %arg13[%c1_58, %c0_59, %c0_60], %122 {strides = array<i32>} : memref<6x16x32xbf16, #tpu.memory_space<vmem>>, vector<1x16x32xbf16>,
    %123 = vector.extract_strided_slice %93 {offsets = [0, 32], sizes = [16, 32], strides = [1, 1]} : vector<16x192xf32> to vector<16x32xf32>
    %124 = arith.truncf %123 : vector<16x32xf32> to vector<16x32xbf16>
    %c1_61 = arith.constant 1 : index
    %c0_62 = arith.constant 0 : index
    %c0_63 = arith.constant 0 : index
    %125 = vector.load %arg11[%c1_61, %c0_62, %c0_63] : memref<6x32x32xbf16, #tpu.memory_space<vmem>>, vector<1x32x32xbf16>
    %126 = vector.shape_cast %125 : vector<1x32x32xbf16> to vector<32x32xbf16>
    %cst_64 = arith.constant dense<0.000000e+00> : vector<16x32xf32>
    %127 = tpu.matmul %124, %126, %cst_64 {dimension_numbers = #tpu.dot_dimension_numbers<[1], [0], [0], [1], [0, 0, 1, 1], [], []>} : vector<16x32xbf16>, vector<32x32xbf16>, vector<16x32xf32> -> vector<16x32xf32>
    %128 = arith.truncf %127 : vector<16x32xf32> to vector<16x32xbf16>
    %c1_65 = arith.constant 1 : index
    %c0_66 = arith.constant 0 : index
    %c0_67 = arith.constant 0 : index
    %129 = vector.load %arg14[%c1_65, %c0_66, %c0_67] : memref<6x16x32xbf16, #tpu.memory_space<vmem>>, vector<1x16x32xbf16>
    %130 = vector.shape_cast %129 : vector<1x16x32xbf16> to vector<16x32xbf16>
    %131 = vector.shape_cast %128 : vector<16x32xbf16> to vector<1x16x32xbf16>
    tpu.vector_store %arg14[%c1_65, %c0_66, %c0_67], %131 {strides = array<i32>} : memref<6x16x32xbf16, #tpu.memory_space<vmem>>, vector<1x16x32xbf16>,
    %132 = vector.extract_strided_slice %33 {offsets = [0, 64], sizes = [16, 32], strides = [1, 1]} : vector<16x192xf32> to vector<16x32xf32>
    %133 = arith.truncf %132 : vector<16x32xf32> to vector<16x32xbf16>
    %c2 = arith.constant 2 : index
    %c0_68 = arith.constant 0 : index
    %c0_69 = arith.constant 0 : index
    %134 = vector.load %arg12[%c2, %c0_68, %c0_69] : memref<6x16x32xbf16, #tpu.memory_space<vmem>>, vector<1x16x32xbf16>
    %135 = vector.shape_cast %134 : vector<1x16x32xbf16> to vector<16x32xbf16>
    %136 = vector.shape_cast %133 : vector<16x32xbf16> to vector<1x16x32xbf16>
    tpu.vector_store %arg12[%c2, %c0_68, %c0_69], %136 {strides = array<i32>} : memref<6x16x32xbf16, #tpu.memory_space<vmem>>, vector<1x16x32xbf16>,
    %137 = vector.extract_strided_slice %63 {offsets = [0, 64], sizes = [16, 32], strides = [1, 1]} : vector<16x192xf32> to vector<16x32xf32>
    %138 = arith.truncf %137 : vector<16x32xf32> to vector<16x32xbf16>
    %c2_70 = arith.constant 2 : index
    %c0_71 = arith.constant 0 : index
    %c0_72 = arith.constant 0 : index
    %139 = vector.load %arg13[%c2_70, %c0_71, %c0_72] : memref<6x16x32xbf16, #tpu.memory_space<vmem>>, vector<1x16x32xbf16>
    %140 = vector.shape_cast %139 : vector<1x16x32xbf16> to vector<16x32xbf16>
    %141 = vector.shape_cast %138 : vector<16x32xbf16> to vector<1x16x32xbf16>
    tpu.vector_store %arg13[%c2_70, %c0_71, %c0_72], %141 {strides = array<i32>} : memref<6x16x32xbf16, #tpu.memory_space<vmem>>, vector<1x16x32xbf16>,
    %142 = vector.extract_strided_slice %93 {offsets = [0, 64], sizes = [16, 32], strides = [1, 1]} : vector<16x192xf32> to vector<16x32xf32>
    %143 = arith.truncf %142 : vector<16x32xf32> to vector<16x32xbf16>
    %c2_73 = arith.constant 2 : index
    %c0_74 = arith.constant 0 : index
    %c0_75 = arith.constant 0 : index
    %144 = vector.load %arg11[%c2_73, %c0_74, %c0_75] : memref<6x32x32xbf16, #tpu.memory_space<vmem>>, vector<1x32x32xbf16>
    %145 = vector.shape_cast %144 : vector<1x32x32xbf16> to vector<32x32xbf16>
    %cst_76 = arith.constant dense<0.000000e+00> : vector<16x32xf32>
    %146 = tpu.matmul %143, %145, %cst_76 {dimension_numbers = #tpu.dot_dimension_numbers<[1], [0], [0], [1], [0, 0, 1, 1], [], []>} : vector<16x32xbf16>, vector<32x32xbf16>, vector<16x32xf32> -> vector<16x32xf32>
    %147 = arith.truncf %146 : vector<16x32xf32> to vector<16x32xbf16>
    %c2_77 = arith.constant 2 : index
    %c0_78 = arith.constant 0 : index
    %c0_79 = arith.constant 0 : index
    %148 = vector.load %arg14[%c2_77, %c0_78, %c0_79] : memref<6x16x32xbf16, #tpu.memory_space<vmem>>, vector<1x16x32xbf16>
    %149 = vector.shape_cast %148 : vector<1x16x32xbf16> to vector<16x32xbf16>
    %150 = vector.shape_cast %147 : vector<16x32xbf16> to vector<1x16x32xbf16>
    tpu.vector_store %arg14[%c2_77, %c0_78, %c0_79], %150 {strides = array<i32>} : memref<6x16x32xbf16, #tpu.memory_space<vmem>>, vector<1x16x32xbf16>,
    %151 = vector.extract_strided_slice %33 {offsets = [0, 96], sizes = [16, 32], strides = [1, 1]} : vector<16x192xf32> to vector<16x32xf32>
    %152 = arith.truncf %151 : vector<16x32xf32> to vector<16x32xbf16>
    %c3 = arith.constant 3 : index
    %c0_80 = arith.constant 0 : index
    %c0_81 = arith.constant 0 : index
    %153 = vector.load %arg12[%c3, %c0_80, %c0_81] : memref<6x16x32xbf16, #tpu.memory_space<vmem>>, vector<1x16x32xbf16>
    %154 = vector.shape_cast %153 : vector<1x16x32xbf16> to vector<16x32xbf16>
    %155 = vector.shape_cast %152 : vector<16x32xbf16> to vector<1x16x32xbf16>
    tpu.vector_store %arg12[%c3, %c0_80, %c0_81], %155 {strides = array<i32>} : memref<6x16x32xbf16, #tpu.memory_space<vmem>>, vector<1x16x32xbf16>,
    %156 = vector.extract_strided_slice %63 {offsets = [0, 96], sizes = [16, 32], strides = [1, 1]} : vector<16x192xf32> to vector<16x32xf32>
    %157 = arith.truncf %156 : vector<16x32xf32> to vector<16x32xbf16>
    %c3_82 = arith.constant 3 : index
    %c0_83 = arith.constant 0 : index
    %c0_84 = arith.constant 0 : index
    %158 = vector.load %arg13[%c3_82, %c0_83, %c0_84] : memref<6x16x32xbf16, #tpu.memory_space<vmem>>, vector<1x16x32xbf16>
    %159 = vector.shape_cast %158 : vector<1x16x32xbf16> to vector<16x32xbf16>
    %160 = vector.shape_cast %157 : vector<16x32xbf16> to vector<1x16x32xbf16>
    tpu.vector_store %arg13[%c3_82, %c0_83, %c0_84], %160 {strides = array<i32>} : memref<6x16x32xbf16, #tpu.memory_space<vmem>>, vector<1x16x32xbf16>,
    %161 = vector.extract_strided_slice %93 {offsets = [0, 96], sizes = [16, 32], strides = [1, 1]} : vector<16x192xf32> to vector<16x32xf32>
    %162 = arith.truncf %161 : vector<16x32xf32> to vector<16x32xbf16>
    %c3_85 = arith.constant 3 : index
    %c0_86 = arith.constant 0 : index
    %c0_87 = arith.constant 0 : index
    %163 = vector.load %arg11[%c3_85, %c0_86, %c0_87] : memref<6x32x32xbf16, #tpu.memory_space<vmem>>, vector<1x32x32xbf16>
    %164 = vector.shape_cast %163 : vector<1x32x32xbf16> to vector<32x32xbf16>
    %cst_88 = arith.constant dense<0.000000e+00> : vector<16x32xf32>
    %165 = tpu.matmul %162, %164, %cst_88 {dimension_numbers = #tpu.dot_dimension_numbers<[1], [0], [0], [1], [0, 0, 1, 1], [], []>} : vector<16x32xbf16>, vector<32x32xbf16>, vector<16x32xf32> -> vector<16x32xf32>
    %166 = arith.truncf %165 : vector<16x32xf32> to vector<16x32xbf16>
    %c3_89 = arith.constant 3 : index
    %c0_90 = arith.constant 0 : index
    %c0_91 = arith.constant 0 : index
    %167 = vector.load %arg14[%c3_89, %c0_90, %c0_91] : memref<6x16x32xbf16, #tpu.memory_space<vmem>>, vector<1x16x32xbf16>
    %168 = vector.shape_cast %167 : vector<1x16x32xbf16> to vector<16x32xbf16>
    %169 = vector.shape_cast %166 : vector<16x32xbf16> to vector<1x16x32xbf16>
    tpu.vector_store %arg14[%c3_89, %c0_90, %c0_91], %169 {strides = array<i32>} : memref<6x16x32xbf16, #tpu.memory_space<vmem>>, vector<1x16x32xbf16>,
    %170 = vector.extract_strided_slice %33 {offsets = [0, 128], sizes = [16, 32], strides = [1, 1]} : vector<16x192xf32> to vector<16x32xf32>
    %171 = arith.truncf %170 : vector<16x32xf32> to vector<16x32xbf16>
    %c4 = arith.constant 4 : index
    %c0_92 = arith.constant 0 : index
    %c0_93 = arith.constant 0 : index
    %172 = vector.load %arg12[%c4, %c0_92, %c0_93] : memref<6x16x32xbf16, #tpu.memory_space<vmem>>, vector<1x16x32xbf16>
    %173 = vector.shape_cast %172 : vector<1x16x32xbf16> to vector<16x32xbf16>
    %174 = vector.shape_cast %171 : vector<16x32xbf16> to vector<1x16x32xbf16>
    tpu.vector_store %arg12[%c4, %c0_92, %c0_93], %174 {strides = array<i32>} : memref<6x16x32xbf16, #tpu.memory_space<vmem>>, vector<1x16x32xbf16>,
    %175 = vector.extract_strided_slice %63 {offsets = [0, 128], sizes = [16, 32], strides = [1, 1]} : vector<16x192xf32> to vector<16x32xf32>
    %176 = arith.truncf %175 : vector<16x32xf32> to vector<16x32xbf16>
    %c4_94 = arith.constant 4 : index
    %c0_95 = arith.constant 0 : index
    %c0_96 = arith.constant 0 : index
    %177 = vector.load %arg13[%c4_94, %c0_95, %c0_96] : memref<6x16x32xbf16, #tpu.memory_space<vmem>>, vector<1x16x32xbf16>
    %178 = vector.shape_cast %177 : vector<1x16x32xbf16> to vector<16x32xbf16>
    %179 = vector.shape_cast %176 : vector<16x32xbf16> to vector<1x16x32xbf16>
    tpu.vector_store %arg13[%c4_94, %c0_95, %c0_96], %179 {strides = array<i32>} : memref<6x16x32xbf16, #tpu.memory_space<vmem>>, vector<1x16x32xbf16>,
    %180 = vector.extract_strided_slice %93 {offsets = [0, 128], sizes = [16, 32], strides = [1, 1]} : vector<16x192xf32> to vector<16x32xf32>
    %181 = arith.truncf %180 : vector<16x32xf32> to vector<16x32xbf16>
    %c4_97 = arith.constant 4 : index
    %c0_98 = arith.constant 0 : index
    %c0_99 = arith.constant 0 : index
    %182 = vector.load %arg11[%c4_97, %c0_98, %c0_99] : memref<6x32x32xbf16, #tpu.memory_space<vmem>>, vector<1x32x32xbf16>
    %183 = vector.shape_cast %182 : vector<1x32x32xbf16> to vector<32x32xbf16>
    %cst_100 = arith.constant dense<0.000000e+00> : vector<16x32xf32>
    %184 = tpu.matmul %181, %183, %cst_100 {dimension_numbers = #tpu.dot_dimension_numbers<[1], [0], [0], [1], [0, 0, 1, 1], [], []>} : vector<16x32xbf16>, vector<32x32xbf16>, vector<16x32xf32> -> vector<16x32xf32>
    %185 = arith.truncf %184 : vector<16x32xf32> to vector<16x32xbf16>
    %c4_101 = arith.constant 4 : index
    %c0_102 = arith.constant 0 : index
    %c0_103 = arith.constant 0 : index
    %186 = vector.load %arg14[%c4_101, %c0_102, %c0_103] : memref<6x16x32xbf16, #tpu.memory_space<vmem>>, vector<1x16x32xbf16>
    %187 = vector.shape_cast %186 : vector<1x16x32xbf16> to vector<16x32xbf16>
    %188 = vector.shape_cast %185 : vector<16x32xbf16> to vector<1x16x32xbf16>
    tpu.vector_store %arg14[%c4_101, %c0_102, %c0_103], %188 {strides = array<i32>} : memref<6x16x32xbf16, #tpu.memory_space<vmem>>, vector<1x16x32xbf16>,
    %189 = vector.extract_strided_slice %33 {offsets = [0, 160], sizes = [16, 32], strides = [1, 1]} : vector<16x192xf32> to vector<16x32xf32>
    %190 = arith.truncf %189 : vector<16x32xf32> to vector<16x32xbf16>
    %c5 = arith.constant 5 : index
    %c0_104 = arith.constant 0 : index
    %c0_105 = arith.constant 0 : index
    %191 = vector.load %arg12[%c5, %c0_104, %c0_105] : memref<6x16x32xbf16, #tpu.memory_space<vmem>>, vector<1x16x32xbf16>
    %192 = vector.shape_cast %191 : vector<1x16x32xbf16> to vector<16x32xbf16>
    %193 = vector.shape_cast %190 : vector<16x32xbf16> to vector<1x16x32xbf16>
    tpu.vector_store %arg12[%c5, %c0_104, %c0_105], %193 {strides = array<i32>} : memref<6x16x32xbf16, #tpu.memory_space<vmem>>, vector<1x16x32xbf16>,
    %194 = vector.extract_strided_slice %63 {offsets = [0, 160], sizes = [16, 32], strides = [1, 1]} : vector<16x192xf32> to vector<16x32xf32>
    %195 = arith.truncf %194 : vector<16x32xf32> to vector<16x32xbf16>
    %c5_106 = arith.constant 5 : index
    %c0_107 = arith.constant 0 : index
    %c0_108 = arith.constant 0 : index
    %196 = vector.load %arg13[%c5_106, %c0_107, %c0_108] : memref<6x16x32xbf16, #tpu.memory_space<vmem>>, vector<1x16x32xbf16>
    %197 = vector.shape_cast %196 : vector<1x16x32xbf16> to vector<16x32xbf16>
    %198 = vector.shape_cast %195 : vector<16x32xbf16> to vector<1x16x32xbf16>
    tpu.vector_store %arg13[%c5_106, %c0_107, %c0_108], %198 {strides = array<i32>} : memref<6x16x32xbf16, #tpu.memory_space<vmem>>, vector<1x16x32xbf16>,
    %199 = vector.extract_strided_slice %93 {offsets = [0, 160], sizes = [16, 32], strides = [1, 1]} : vector<16x192xf32> to vector<16x32xf32>
    %200 = arith.truncf %199 : vector<16x32xf32> to vector<16x32xbf16>
    %c5_109 = arith.constant 5 : index
    %c0_110 = arith.constant 0 : index
    %c0_111 = arith.constant 0 : index
    %201 = vector.load %arg11[%c5_109, %c0_110, %c0_111] : memref<6x32x32xbf16, #tpu.memory_space<vmem>>, vector<1x32x32xbf16>
    %202 = vector.shape_cast %201 : vector<1x32x32xbf16> to vector<32x32xbf16>
    %cst_112 = arith.constant dense<0.000000e+00> : vector<16x32xf32>
    %203 = tpu.matmul %200, %202, %cst_112 {dimension_numbers = #tpu.dot_dimension_numbers<[1], [0], [0], [1], [0, 0, 1, 1], [], []>} : vector<16x32xbf16>, vector<32x32xbf16>, vector<16x32xf32> -> vector<16x32xf32>
    %204 = arith.truncf %203 : vector<16x32xf32> to vector<16x32xbf16>
    %c5_113 = arith.constant 5 : index
    %c0_114 = arith.constant 0 : index
    %c0_115 = arith.constant 0 : index
    %205 = vector.load %arg14[%c5_113, %c0_114, %c0_115] : memref<6x16x32xbf16, #tpu.memory_space<vmem>>, vector<1x16x32xbf16>
    %206 = vector.shape_cast %205 : vector<1x16x32xbf16> to vector<16x32xbf16>
    %207 = vector.shape_cast %204 : vector<16x32xbf16> to vector<1x16x32xbf16>
    tpu.vector_store %arg14[%c5_113, %c0_114, %c0_115], %207 {strides = array<i32>} : memref<6x16x32xbf16, #tpu.memory_space<vmem>>, vector<1x16x32xbf16>,
    return
  }
  func.func @transform_0(%arg0: i32) -> (i32, i32) {
    %c0_i32 = arith.constant 0 : i32
    %c0_i32_0 = arith.constant 0 : i32
    return %arg0, %c0_i32 : i32, i32
  }
  func.func @transform_1(%arg0: i32) -> (i32, i32) {
    %c0_i32 = arith.constant 0 : i32
    %c0_i32_0 = arith.constant 0 : i32
    %c0_i32_1 = arith.constant 0 : i32
    return %c0_i32, %c0_i32_0 : i32, i32
  }
  func.func @transform_2(%arg0: i32) -> (i32, i32) {
    %c0_i32 = arith.constant 0 : i32
    %c0_i32_0 = arith.constant 0 : i32
    %c0_i32_1 = arith.constant 0 : i32
    return %c0_i32, %c0_i32_0 : i32, i32
  }
  func.func @transform_3(%arg0: i32) -> (i32, i32) {
    %c0_i32 = arith.constant 0 : i32
    %c0_i32_0 = arith.constant 0 : i32
    %c0_i32_1 = arith.constant 0 : i32
    return %c0_i32, %c0_i32_0 : i32, i32
  }
  func.func @transform_4(%arg0: i32) -> (i32, i32) {
    %c0_i32 = arith.constant 0 : i32
    %c0_i32_0 = arith.constant 0 : i32
    %c0_i32_1 = arith.constant 0 : i32
    return %c0_i32, %c0_i32_0 : i32, i32
  }
  func.func @transform_5(%arg0: i32) -> (i32, i32) {
    %c0_i32 = arith.constant 0 : i32
    %c0_i32_0 = arith.constant 0 : i32
    %c0_i32_1 = arith.constant 0 : i32
    return %c0_i32, %c0_i32_0 : i32, i32
  }
  func.func @transform_6(%arg0: i32) -> (i32, i32) {
    %c0_i32 = arith.constant 0 : i32
    %c0_i32_0 = arith.constant 0 : i32
    %c0_i32_1 = arith.constant 0 : i32
    return %c0_i32, %c0_i32_0 : i32, i32
  }
  func.func @transform_7(%arg0: i32) -> (i32, i32) {
    %c0_i32 = arith.constant 0 : i32
    %c0_i32_0 = arith.constant 0 : i32
    %c0_i32_1 = arith.constant 0 : i32
    return %c0_i32, %c0_i32_0 : i32, i32
  }
  func.func @transform_8(%arg0: i32) -> (i32, i32) {
    %c0_i32 = arith.constant 0 : i32
    %c0_i32_0 = arith.constant 0 : i32
    %c0_i32_1 = arith.constant 0 : i32
    return %c0_i32, %c0_i32_0 : i32, i32
  }
  func.func @transform_9(%arg0: i32) -> (i32, i32) {
    %c0_i32 = arith.constant 0 : i32
    %c0_i32_0 = arith.constant 0 : i32
    %c0_i32_1 = arith.constant 0 : i32
    return %c0_i32, %c0_i32_0 : i32, i32
  }
  func.func @transform_10(%arg0: i32) -> (i32, i32, i32) {
    %c0_i32 = arith.constant 0 : i32
    %c0_i32_0 = arith.constant 0 : i32
    %c0_i32_1 = arith.constant 0 : i32
    %c0_i32_2 = arith.constant 0 : i32
    return %c0_i32, %c0_i32_0, %c0_i32_1 : i32, i32, i32
  }
  func.func @transform_11(%arg0: i32) -> (i32, i32, i32) {
    %c0_i32 = arith.constant 0 : i32
    %c0_i32_0 = arith.constant 0 : i32
    %c0_i32_1 = arith.constant 0 : i32
    return %c0_i32, %arg0, %c0_i32_0 : i32, i32, i32
  }
  func.func @transform_12(%arg0: i32) -> (i32, i32, i32) {
    %c0_i32 = arith.constant 0 : i32
    %c0_i32_0 = arith.constant 0 : i32
    %c0_i32_1 = arith.constant 0 : i32
    return %c0_i32, %arg0, %c0_i32_0 : i32, i32, i32
  }
  func.func @transform_13(%arg0: i32) -> (i32, i32, i32) {
    %c0_i32 = arith.constant 0 : i32
    %c0_i32_0 = arith.constant 0 : i32
    %c0_i32_1 = arith.constant 0 : i32
    return %c0_i32, %arg0, %c0_i32_0 : i32, i32, i32
  }
}

</mosaic_0001>

<bundles_post_ra>
// kernel: tpu_custom_call.1
= control target key start
LH: loop header
LB: loop body
LE: loop exit
PB: predicated region body
PF: predicated region fallthrough
CT: control target
= control target key end

     0   :  { %19 = vsyncpa [#allocation3], 0  ;;  %s1729_s0 = inlined_call_operand.hbm [shape: f32[16,32], index: 0, kind: input, shape index: {}]   ;;  %s1730_s1 = inlined_call_operand.hbm [shape: bf16[32,192], index: 1, kind: input, shape index: {}]   ;;  %s1731_s2 = inlined_call_operand.hbm [shape: f32[1,192], index: 2, kind: input, shape index: {}]   ;;  %s1732_s3 = inlined_call_operand.vmem [shape: f32[1,192], index: 3, kind: input, shape index: {}]   ;;  %s1733_s4 = inlined_call_operand.hbm [shape: bf16[32,192], index: 4, kind: input, shape index: {}]   ;;  %s1734_s5 = inlined_call_operand.vmem [shape: f32[1,192], index: 5, kind: input, shape index: {}]   ;;  %s1735_s6 = inlined_call_operand.hbm [shape: f32[1,192], index: 6, kind: input, shape index: {}]   ;;  %s1736_s7 = inlined_call_operand.hbm [shape: bf16[32,192], index: 7, kind: input, shape index: {}]   ;;  %s1737_s8 = inlined_call_operand.vmem [shape: f32[1,192], index: 8, kind: input, shape index: {}]   ;;  %s1738_s9 = inlined_call_operand.vmem [shape: f32[1,192], index: 9, kind: input, shape index: {}]   ;;  %s1739_s10 = inlined_call_operand.hbm [shape: bf16[6,32,32], index: 10, kind: input, shape index: {}]   ;;  %s1740_s11 = inlined_call_operand.hbm [shape: bf16[6,16,32], index: 11, kind: output, shape index: {0}]   ;;  %s1741_s12 = inlined_call_operand.hbm [shape: bf16[6,16,32], index: 12, kind: output, shape index: {1}]   ;;  %s1742_s13 = inlined_call_operand.hbm [shape: bf16[6,16,32], index: 13, kind: output, shape index: {2}]  }
   0x1   :  { %20 = vsyncpa [#allocation6], 0 }
   0x2   :  { %21 = vsyncpa [#allocation9], 0 }
   0x3   :  { %22 = vsyncpa [#allocation12], 0 }
   0x4   :  { %23 = vsyncpa [#allocation4], 0 }
   0x5   :  { %24 = vsyncpa [#allocation16], 0  ;;  %s42_s27 = sshll.u32 %s1730_s1, 4  ;;  %s1381_s28 = smov [#allocation5]   ;;  %s43_s27 = int_to_ptr.hbm [resolvable:$true] %s42_s27 }
   0x6   :  { %s44_s29 = sshll.u32 %s1381_s28, 4  ;;  %s68_s15 = sshll.u32 %s1733_s4, 4  ;;  %s45_s29 = int_to_ptr.vmem [resolvable:$true] %s44_s29  ;;  %s69_s15 = int_to_ptr.hbm [resolvable:$true] %s68_s15 }
   0x7   :  { %s1382_s16 = smov 128   ;;  %s1383_s17 = smov 8  }
   0x8   :  { %50 = dma.hbm_to_vmem [thread:$0]  %s43_s27, 512, %s45_s29, [#allocation6], %s1382_s16, %s1382_s16, %s1383_s17  }
   0x9   :  { %s1384_s18 = smov [#allocation8]   ;;  %s94_s22 = sshll.u32 %s1736_s7, 4  ;;  %s95_s22 = int_to_ptr.hbm [resolvable:$true] %s94_s22 }
   0xa   :  { %s70_s19 = sshll.u32 %s1384_s18, 4  ;;  %s29_s24 = sshll.u32 %s1729_s0, 4  ;;  %s71_s19 = int_to_ptr.vmem [resolvable:$true] %s70_s19  ;;  %s30_s24 = int_to_ptr.hbm [resolvable:$true] %s29_s24 }
   0xb   :  { %76 = dma.hbm_to_vmem [thread:$0]  %s69_s15, 512, %s71_s19, [#allocation9], %s1382_s16, %s1382_s16, %s1383_s17  }
   0xc   :  { %s1385_s25 = smov [#allocation11]   ;;  %s1386_s4 = smov [#allocation2]  }
   0xd   :  { %s96_s26 = sshll.u32 %s1385_s25, 4  ;;  %s31_s27 = sshll.u32 %s1386_s4, 4  ;;  %s97_s26 = int_to_ptr.vmem [resolvable:$true] %s96_s26  ;;  %s32_s27 = int_to_ptr.vmem [resolvable:$true] %s31_s27 }
   0xe   :  { %102 = dma.hbm_to_vmem [thread:$0]  %s95_s22, 512, %s97_s26, [#allocation12], %s1382_s16, %s1382_s16, %s1383_s17  }
   0xf   :  { %s56_s30 = sshll.u32 %s1731_s2, 4  ;;  %s84_s15 = sshll.u32 %s1735_s6, 4  ;;  %s57_s30 = int_to_ptr.hbm [resolvable:$true] %s56_s30  ;;  %s85_s15 = int_to_ptr.hbm [resolvable:$true] %s84_s15 }
  0x10   :  { %37 = dma.hbm_to_vmem [thread:$0]  %s30_s24, 256, %s32_s27, [#allocation3], %s1382_s16, %s1382_s16, %s1383_s17  }
  0x11   :  { %s1387_s18 = smov [#allocation7]   ;;  %s1388_s19 = smov [#allocation10]  }
  0x12   :  { %s58_s0 = sshll.u32 %s1387_s18, 4  ;;  %s86_s20 = sshll.u32 %s1388_s19, 4  ;;  %s59_s0 = int_to_ptr.vmem [resolvable:$true] %s58_s0  ;;  %s87_s20 = int_to_ptr.vmem [resolvable:$true] %s86_s20 }
  0x13   :  { %61 = dma.hbm_to_vmem [thread:$0]  %s57_s30, 32, %s59_s0, [#allocation6]  }
  0x14   :  { %s111_s1 = sshll.u32 %s1739_s10, 4  ;;  %s1389_s2 = smov [#allocation13]   ;;  %s112_s1 = int_to_ptr.hbm [resolvable:$true] %s111_s1 }
  0x15   :  { %89 = dma.hbm_to_vmem [thread:$0]  %s85_s15, 32, %s87_s20, [#allocation9]  }
  0x16   :  { %s113_s16 = sshll.u32 %s1389_s2, 4  ;;  %s1390_s17 = smov 64   ;;  %s114_s16 = int_to_ptr.vmem [resolvable:$true] %s113_s16 }
  0x17   :  { %s1391_s23 = smov 4  }
  0x18   :  { %119 = dma.hbm_to_vmem [thread:$0]  %s112_s1, 1536, %s114_s16, [#allocation12], %s1390_s17, %s1390_s17, %s1391_s23  }
  0x19   :  { %1369 = dma.done.wait [#allocation3], 256  }
  0x1a   :  { %1370 = vsyncadd [#allocation3], 4294967040 }
  0x1b   :  { %1371 = dma.done.wait [#allocation6], 544  }
  0x1c   :  { %1372 = vsyncadd [#allocation6], 4294966752 }
  0x1d   :  { %1373 = dma.done.wait [#allocation9], 544  }
  0x1e   :  { %1374 = vsyncadd [#allocation9], 4294966752 }
  0x1f   :  { %1375 = dma.done.wait [#allocation12], 2048  }
  0x20   :  { %1376 = vsyncadd [#allocation12], 4294965248  ;;  %v979_v0 = vld [vmem:[#allocation5 + $0x10] sm:$0xf]  ;;  %v1080_v1 = vld [vmem:[#allocation5 + $0x14] sm:$0xf0] }
  0x21   :  { %v1079_v2 = vld [vmem:[#allocation5 + $0x14] sm:$0xf]  ;;  %v980_v3 = vor.u32 %v1080_v1, %v979_v0  ;;  %v981_v4 = vld [vmem:[#allocation5 + $0x18] sm:$0xf0]  ;;  %v971_v5 = vld [vmem:[#allocation5] sm:$0xf] }
  0x22   :  { %v1078_v6 = vld [vmem:[#allocation5 + $0x4] sm:$0xf0]  ;;  %v984_v7 = vor.u32 %v1079_v2, %v981_v4  ;;  %v1077_v8 = vld [vmem:[#allocation5 + $0x4] sm:$0xf]  ;;  %v973_v9 = vld [vmem:[#allocation5 + $0x8] sm:$0xf0] }
  0x23   :  { %v149_v10 = vld [vmem:[#allocation2] sm:$0xff]  ;;  %186 = vmatpush.bf16.msra.mxu0 %v980_v3  ;;  %v972_v11 = vor.u32 %v1078_v6, %v971_v5  ;;  %v150_v12 = vld [vmem:[#allocation2 + $0x8] sm:$0xff]  ;;  %v1017_v14 = vld [vmem:[#allocation11 + $0x18] sm:$0xf0]  ;;  %v976_v15 = vor.u32 %v1077_v8, %v973_v9  ;;  %vm176_vm0 = vcmask 261120   ;;  %vm210_vm1 = vcmask 523264  }
  0x24   :  { %v1087_v13 = vld [vmem:[#allocation11 + $0x14] sm:$0xf]  ;;  %200 = vmatpush.bf16.msra.mxu1 %v984_v7  ;;  %v1015_v16 = vld [vmem:[#allocation11 + $0x10] sm:$0xf]  ;;  %v1088_v17 = vld [vmem:[#allocation11 + $0x14] sm:$0xf0]  ;;  %v151_v22 = vpack.c.bf16 %v150_v12, %v149_v10 }
  0x25   :  { %v1020_v18 = vor.u32 %v1087_v13, %v1017_v14  ;;  %v1016_v19 = vor.u32 %v1088_v17, %v1015_v16  ;;  %v1007_v20 = vld [vmem:[#allocation11] sm:$0xf]  ;;  %v1086_v21 = vld [vmem:[#allocation11 + $0x4] sm:$0xf0]  ;;  %v1085_v23 = vld [vmem:[#allocation11 + $0x4] sm:$0xf] }
  0x26   :  { %v1009_v24 = vld [vmem:[#allocation11 + $0x8] sm:$0xf0]  ;;  %v1008_v25 = vor.u32 %v1086_v21, %v1007_v20  ;;  %v1083_v27 = vld [vmem:[#allocation8 + $0x14] sm:$0xf]  ;;  %v999_v28 = vld [vmem:[#allocation8 + $0x18] sm:$0xf0] }
  0x27   :  { %187 = vmatpush.bf16.msra.mxu0 %v972_v11  ;;  %v1012_v26 = vor.u32 %v1085_v23, %v1009_v24  ;;  %v997_v29 = vld [vmem:[#allocation8 + $0x10] sm:$0xf]  ;;  %v1002_v31 = vor.u32 %v1083_v27, %v999_v28  ;;  %v1084_v32 = vld [vmem:[#allocation8 + $0x14] sm:$0xf0]  ;;  %v1081_v33 = vld [vmem:[#allocation8 + $0x4] sm:$0xf] }
  0x28   :  { %201 = vmatpush.bf16.msra.mxu1 %v976_v15  ;;  %v991_v34 = vld [vmem:[#allocation8 + $0x8] sm:$0xf0]  ;;  %v998_v36 = vor.u32 %v1084_v32, %v997_v29  ;;  %v989_v37 = vld [vmem:[#allocation8] sm:$0xf]  ;;  %v1082_v38 = vld [vmem:[#allocation8 + $0x4] sm:$0xf0] }
  0x29   :  { %341 = vmatpush.bf16.msra.mxu3 %v1002_v31  ;;  %v994_v39 = vor.u32 %v1081_v33, %v991_v34  ;;  %v990_v40 = vor.u32 %v1082_v38, %v989_v37  ;;  %v1090_v1 = vld [vmem:[#allocation13 + $0x8] sm:$0xff]  ;;  %v1089_v4 = vld [vmem:[#allocation13] sm:$0xff]  ;;  %vm571_vm8 = vcmask 257024   ;;  %s931_s7 = sshll.u32 %s1741_s12, 4  ;;  %s1395_s14 = smov [#allocation17]   ;;  %s932_s7 = int_to_ptr.hbm [resolvable:$true] %s931_s7 }
  0x2a   :  { %985 = vmatmul.msk.bf16.vlgmr.msra.gmra.mxu0 %vm176_vm0, %v151_v22  ;;  %327 = vmatpush.bf16.msra.mxu2 %v998_v36  ;;  %v1097_v21 = vld [vmem:[#allocation13 + $0x40] sm:$0xff]  ;;  %v486_v32 = vld [vmem:[%s1738_s9] sm:$0x3]  ;;  %s1393_s9 = smov 96   ;;  %s942_s15 = sshll.u32 %s1395_s14, 4  ;;  %s943_s15 = int_to_ptr.vmem [resolvable:$true] %s942_s15 }
  0x2b   :  { %463 = vmatpush.bf16.msrb.mxu0 %v1016_v19  ;;  %986 = vmatmul.msk.bf16.vlgmr.msra.gmra.mxu1 %vm176_vm0, %v151_v22  ;;  %v557_v37 = vperm.slane %v486_v32, 0  ;;  %s944_s19 = sshll.u32 %s1742_s13, 4  ;;  %s1396_s12 = smov [#allocation14]   ;;  %s945_s19 = int_to_ptr.hbm [resolvable:$true] %s944_s19 }
  0x2c   :  { %477 = vmatpush.bf16.msrb.mxu1 %v1020_v18  ;;  %v1098_v18 = vld [vmem:[#allocation13 + $0x48] sm:$0xff]  ;;  %s916_s13 = sshll.u32 %s1396_s12, 4  ;;  %s918_s22 = sshll.u32 %s1740_s11, 4  ;;  %s917_s13 = int_to_ptr.vmem [resolvable:$true] %s916_s13  ;;  %s919_s22 = int_to_ptr.hbm [resolvable:$true] %s918_s22 }
  0x2d   :  { %342 = vmatpush.bf16.msra.mxu3 %v994_v39 }
  0x2e   :  { %328 = vmatpush.bf16.msra.mxu2 %v990_v40 }
  0x2f   :  { %464 = vmatpush.bf16.msrb.mxu0 %v1008_v25  ;;  %v485_v25 = vld [vmem:[%s1737_s8] sm:$0x3]  ;;  %s1392_s8 = smov 32  }
  0x30   :  { %478 = vmatpush.bf16.msrb.mxu1 %v1012_v26  ;;  %1004 = vmatmul.msk.bf16.vlgmr.msra.gmra.mxu3 %vm176_vm0, %v151_v22  ;;  %v548_v29 = vperm.slane %v485_v25, 0 }
  0x31   :  { %1003 = vmatmul.msk.bf16.vlgmr.msra.gmra.mxu2 %vm176_vm0, %v151_v22 }
  0x32   :  { %604 = vmatpush.bf16.msrb.mxu2 %v1090_v1 }
  0x36   :  { %605 = vmatpush.bf16.msrb.mxu2 %v1089_v4 }
  0x3a   :  { %1021 = vmatmul.msk.bf16.vlgmr.msrb.gmra.mxu0 %vm176_vm0, %v151_v22  ;;  %835 = vmatpush.bf16.msra.mxu2 %v1098_v18 }
  0x3b   :  { %1022 = vmatmul.msk.bf16.vlgmr.msrb.gmra.mxu1 %vm176_vm0, %v151_v22 }
  0x3e   :  { %836 = vmatpush.bf16.msra.mxu2 %v1097_v21 }
  0xa7   :  { %v1495_v30 = vpop.f32.mrf.mxu0 }
  0xa8   :  { %v1497_v35 = vpop.f32.mrf.mxu1 }
  0xaf   :  { %v1499_v41 = vpop.f32.mrf.mxu0 }
  0xb0   :  { %v1501_v42 = vpop.f32.mrf.mxu1  ;;  %v221_v21 = vmul.f32 %v1499_v41, %v1499_v41 }
  0xb7   :  { %v1505_v43 = vpop.f32.mrf.mxu0 }
  0xb8   :  { %v1507_v44 = vpop.f32.mrf.mxu1  ;;  %v495_v45 = vmul.f32 %v1505_v43, %v1505_v43 }
  0xb9   :  { %v487_v46 = vsel %vm210_vm1, %v1507_v44, 0.0  ;;  %v496_v47 = vmul.f32 %v1507_v44, %v1507_v44 }
  0xba   :  { %v488_v48 = vadd.f32 %v487_v46, %v1505_v43 }
  0xbb   :  { %v499_v49 = vsel %vm210_vm1, %v496_v47, 0.0 }
  0xbc   :  { %489 = vadd.xlane.f32.xlu0 %v488_v48  ;;  %v500_v50 = vadd.f32 %v499_v49, %v495_v45  ;;  %v549_v49 = vperm.slane %v485_v25, 1 }
  0xbe   :  { %501 = vadd.xlane.f32.xlu1 %v500_v50 }
  0xbf   :  { %v1517_v51 = vpop.f32.mrf.mxu0 }
  0xc0   :  { %v1519_v52 = vpop.f32.mrf.mxu1  ;;  %v497_v53 = vmul.f32 %v1517_v51, %v1517_v51 }
  0xc1   :  { %v498_v54 = vmul.f32 %v1519_v52, %v1519_v52  ;;  %v491_v55 = vsel %vm210_vm1, %v1519_v52, 0.0 }
  0xc2   :  { %v492_v56 = vadd.f32 %v491_v55, %v1517_v51 }
  0xc3   :  { %v503_v57 = vsel %vm210_vm1, %v498_v54, 0.0 }
  0xc4   :  { %493 = vadd.xlane.f32.xlu0 %v492_v56  ;;  %v504_v58 = vadd.f32 %v503_v57, %v497_v53 }
  0xc6   :  { %505 = vadd.xlane.f32.xlu1 %v504_v58 }
 0x12f   :  { %v490_v59 = vpop.xlane.xlu0 %489 }
 0x130   :  { %v507_v60 = vmul.f32 0.0052083335, %v490_v59 }
 0x131   :  { %v502_v61 = vpop.xlane.xlu1 %501 }
 0x132   :  { %v509_v62 = vmul.f32 0.0052083335, %v502_v61  ;;  %v511_v63 = vmul.f32 %v507_v60, %v507_v60  ;;  %v517_v26 = vsub.f32 %v1505_v43, %v507_v60  ;;  %v518_v43 = vsub.f32 %v1507_v44, %v507_v60  ;;  %v1545_v61 = vpop.f32.mrf.mxu3 }
 0x134   :  { %v513_v0 = vsub.f32 %v509_v62, %v511_v63  ;;  %v1547_v62 = vpop.f32.mrf.mxu2  ;;  %v351_v63 = vsel %vm210_vm1, %v1545_v61, 0.0 }
 0x135   :  { %v352_v1 = vadd.f32 %v351_v63, %v1547_v62  ;;  %v359_v4 = vmul.f32 %v1547_v62, %v1547_v62 }
 0x136   :  { %v515_v2 = vmax.f32 %v513_v0, 0.0  ;;  %v215_v0 = vsel %vm210_vm1, %v1501_v42, 0.0 }
 0x137   :  { %v494_v3 = vpop.xlane.xlu0 %493 }
 0x138   :  { %v521_v5 = vadd.f32 1e-05, %v515_v2  ;;  %v508_v6 = vmul.f32 0.0052083335, %v494_v3  ;;  %v360_v2 = vmul.f32 %v1545_v61, %v1545_v61  ;;  %v216_v3 = vadd.f32 %v215_v0, %v1499_v41 }
 0x139   :  { %v506_v7 = vpop.xlane.xlu1 %505 }
 0x13a   :  { %1117 = vrsqrt.f32 %v521_v5  ;;  %v510_v8 = vmul.f32 0.0052083335, %v506_v7  ;;  %v512_v9 = vmul.f32 %v508_v6, %v508_v6  ;;  %vm529_vm3 = vweird.f32 %v521_v5 }
 0x13b   :  { %v519_v34 = vsub.f32 %v1517_v51, %v508_v6  ;;  %v520_v38 = vsub.f32 %v1519_v52, %v508_v6  ;;  %v558_v51 = vperm.slane %v486_v32, 1  ;;  %v211_v6 = vsel %vm210_vm1, %v1497_v35, 0.0  ;;  %v1095_v32 = vld [vmem:[#allocation13 + $0x30] sm:$0xff] }
 0x13c   :  { %v514_v10 = vsub.f32 %v510_v8, %v512_v9  ;;  %v212_v8 = vadd.f32 %v211_v6, %v1495_v30  ;;  %v1563_v9 = vpop.f32.mrf.mxu3 }
 0x13d   :  { %v362_v25 = vmul.f32 %v1563_v9, %v1563_v9 }
 0x13e   :  { %v516_v11 = vmax.f32 %v514_v10, 0.0  ;;  %v1092_v10 = vld [vmem:[#allocation13 + $0x18] sm:$0xff] }
 0x13f   :  { %667 = vmatpush.bf16.msrb.mxu3 %v1092_v10 }
 0x140   :  { %v1118_v12 = vpop.eup %1117  ;;  %v522_v14 = vadd.f32 1e-05, %v516_v11  ;;  %v1091_v11 = vld [vmem:[#allocation13 + $0x10] sm:$0xff] }
 0x141   :  { %v524_v13 = vmul.f32 %v1118_v12, %v521_v5  ;;  %vm530_vm2 = vweird.f32 %v1118_v12  ;;  %v363_v5 = vsel %vm210_vm1, %v360_v2, 0.0 }
 0x142   :  { %1119 = vrsqrt.f32 %v522_v14  ;;  %vm531_vm4 = vmor %vm529_vm3, %vm530_vm2  ;;  %vm539_vm6 = vweird.f32 %v522_v14  ;;  %v364_v7 = vadd.f32 %v363_v5, %v359_v4 }
 0x143   :  { %v525_v15 = vmul.f32 %v1118_v12, %v524_v13  ;;  %v355_v13 = vsel %vm210_vm1, %v1563_v9, 0.0  ;;  %668 = vmatpush.bf16.msrb.mxu3 %v1091_v11  ;;  %v1602_v11 = vld [vmem:[%s1734_s5] sm:$0x3] }
 0x145   :  { %v526_v16 = vmul.f32 0.5, %v525_v15  ;;  %v220_v15 = vmul.f32 %v1497_v35, %v1497_v35 }
 0x147   :  { %v527_v17 = vsub.f32 1.5, %v526_v16  ;;  %v219_v16 = vmul.f32 %v1495_v30, %v1495_v30 }
 0x148   :  { %v1120_v19 = vpop.eup %1119 }
 0x149   :  { %v528_v20 = vmul.f32 %v1118_v12, %v527_v17  ;;  %v534_v22 = vmul.f32 %v1120_v19, %v522_v14  ;;  %vm540_vm5 = vweird.f32 %v1120_v19  ;;  %v223_v17 = vsel %vm210_vm1, %v220_v15, 0.0  ;;  %v1605_v15 = vld [vmem:[#allocation10] sm:$0x3] }
 0x14a   :  { %vm541_vm7 = vmor %vm539_vm6, %vm540_vm5  ;;  %v224_v18 = vadd.f32 %v223_v17, %v219_v16 }
 0x14b   :  { %v532_v23 = vsel %vm531_vm4, %v1118_v12, %v528_v20  ;;  %v535_v24 = vmul.f32 %v1120_v19, %v534_v22  ;;  %v1565_v12 = vpop.f32.mrf.mxu2  ;;  %v1100_v20 = vld [vmem:[#allocation13 + $0x58] sm:$0xff] }
 0x14c   :  { %v543_v28 = vmul.f32 %v532_v23, %v517_v26  ;;  %v544_v48 = vmul.f32 %v532_v23, %v518_v43  ;;  %v356_v14 = vadd.f32 %v355_v13, %v1565_v12  ;;  %899 = vmatpush.bf16.msra.mxu3 %v1100_v20  ;;  %v1099_v23 = vld [vmem:[#allocation13 + $0x50] sm:$0xff]  ;;  %v1094_v26 = vld [vmem:[#allocation13 + $0x28] sm:$0xff] }
 0x14d   :  { %v536_v27 = vmul.f32 0.5, %v535_v24  ;;  %726 = vmatpush.bf16.msra.mxu0 %v1094_v26 }
 0x14e   :  { %v552_v36 = vmul.f32 %v548_v29, %v543_v28  ;;  %v553_v56 = vmul.f32 %v549_v49, %v544_v48  ;;  %v361_v28 = vmul.f32 %v1565_v12, %v1565_v12 }
 0x14f   :  { %v537_v31 = vsub.f32 1.5, %v536_v27  ;;  %v1096_v27 = vld [vmem:[#allocation13 + $0x38] sm:$0xff] }
 0x150   :  { %v561_v47 = vadd.f32 %v557_v37, %v552_v36  ;;  %v562_v44 = vadd.f32 %v558_v51, %v553_v56  ;;  %900 = vmatpush.bf16.msra.mxu3 %v1099_v23  ;;  %785 = vmatpush.bf16.msra.mxu1 %v1096_v27 }
 0x151   :  { %v538_v33 = vmul.f32 %v1120_v19, %v537_v31  ;;  %v1093_v31 = vld [vmem:[#allocation13 + $0x20] sm:$0xff] }
 0x152   :  { %v565_v54 = vmax.f32 %v561_v47, 0.0  ;;  %v566_v59 = vmax.f32 %v562_v44, 0.0  ;;  %727 = vmatpush.bf16.msra.mxu0 %v1093_v31 }
 0x153   :  { %v542_v39 = vsel %vm541_vm7, %v1120_v19, %v538_v33  ;;  %v222_v19 = vmul.f32 %v1501_v42, %v1501_v42 }
 0x154   :  { %v545_v40 = vmul.f32 %v542_v39, %v519_v34  ;;  %v546_v45 = vmul.f32 %v542_v39, %v520_v38  ;;  %786 = vmatpush.bf16.msra.mxu1 %v1095_v32 }
 0x155   :  { %v227_v22 = vsel %vm210_vm1, %v222_v19, 0.0 }
 0x156   :  { %v554_v46 = vmul.f32 %v548_v29, %v545_v40  ;;  %v555_v53 = vmul.f32 %v549_v49, %v546_v45  ;;  %v228_v24 = vadd.f32 %v227_v22, %v221_v21  ;;  %v367_v29 = vsel %vm210_vm1, %v362_v25, 0.0 }
 0x157   :  { %v368_v33 = vadd.f32 %v367_v29, %v361_v28  ;;  %v412_v21 = vperm.slane %v1602_v11, 0  ;;  %v413_v22 = vperm.slane %v1602_v11, 1 }
 0x158   :  { %v563_v50 = vadd.f32 %v557_v37, %v554_v46  ;;  %v564_v58 = vadd.f32 %v558_v51, %v555_v53 }
 0x15a   :  { %v567_v55 = vmax.f32 %v563_v50, 0.0  ;;  %v568_v52 = vmax.f32 %v564_v58, 0.0 }
 0x15c   :  { %v578_v57 = vpack.c.bf16 %v567_v55, %v565_v54  ;;  %v808_v60 = vpack.c.bf16 %v568_v52, %v566_v59 }
 0x15e   :  { %762 = vrot.lane.b32.xlu1 %v578_v57, %s1392_s8  ;;  %703 = vrot.lane.b32.xlu0 %v578_v57, %s1390_s17 }
 0x15f   :  { %644 = vrot.lane.b32.xlu2 %v578_v57, %s1393_s9  ;;  %1031 = vmatmul.msk.bf16.vlgmr.msrb.gmra.mxu2 %vm176_vm0, %v578_v57 }
 0x167   :  { %876 = vrot.lane.b32.xlu2 %v808_v60, %s1393_s9 }
 0x16f   :  { %1067 = vmatmul.msk.bf16.vlgmr.msra.gmra.mxu2 %vm176_vm0, %v808_v60 }
 0x188   :  { %353 = vadd.xlane.f32.xlu1 %v352_v1  ;;  %217 = vadd.xlane.f32.xlu0 %v216_v3 }
 0x190   :  { %213 = vadd.xlane.f32.xlu2 %v212_v8  ;;  %365 = vadd.xlane.f32.xlu0 %v364_v7 }
 0x198   :  { %357 = vadd.xlane.f32.xlu2 %v356_v14 }
 0x1a0   :  { %225 = vadd.xlane.f32.xlu2 %v224_v18 }
 0x1a8   :  { %229 = vadd.xlane.f32.xlu2 %v228_v24 }
 0x1b0   :  { %369 = vadd.xlane.f32.xlu2 %v368_v33 }
 0x1b9   :  { %v645_v34 = vpop.permute.xlu2 %644 }
 0x1ba   :  { %1040 = vmatmul.msk.bf16.vlgmr.msrb.gmra.mxu3 %vm176_vm0, %v645_v34 }
 0x1c1   :  { %v877_v36 = vpop.permute.xlu2 %876 }
 0x1ca   :  { %1076 = vmatmul.msk.bf16.vlgmr.msra.gmra.mxu3 %vm176_vm0, %v877_v36 }
 0x1d0   :  { %v763_v37 = vpop.permute.xlu1 %762  ;;  %v704_v38 = vpop.permute.xlu0 %703 }
 0x1d1   :  { %1049 = vmatmul.msk.bf16.vlgmr.msra.gmra.mxu0 %vm176_vm0, %v704_v38  ;;  %1058 = vmatmul.msk.bf16.vlgmr.msra.gmra.mxu1 %vm176_vm0, %v763_v37 }
 0x1e2   :  { %v607_v39 = vpop.f32.mrf.mxu2 }
 0x1e3   :  { %v612_v40 = vpack.c.bf16 %v607_v39, %v607_v39 }
 0x1e5   :  { %614 = vst.msk [vmem:[#allocation17] sm:$0xf] %vm571_vm8, %v612_v40 }
 0x1ea   :  { %v609_v43 = vpop.f32.mrf.mxu2 }
 0x1eb   :  { %v613_v45 = vpack.c.bf16 %v609_v43, %v609_v43 }
 0x1ed   :  { %615 = vst.msk [vmem:[#allocation17 + $0x4] sm:$0xf] %vm571_vm8, %v613_v45 }
 0x1f2   :  { %v838_v46 = vpop.f32.mrf.mxu2 }
 0x1f3   :  { %v843_v47 = vpack.c.bf16 %v838_v46, %v838_v46 }
 0x1f5   :  { %846 = vst.msk [vmem:[#allocation17 + $0x20] sm:$0xf] %vm571_vm8, %v843_v47 }
 0x1fa   :  { %v840_v48 = vpop.f32.mrf.mxu2 }
 0x1fb   :  { %v844_v49 = vpack.c.bf16 %v840_v48, %v840_v48  ;;  %v218_v50 = vpop.xlane.xlu0 %217  ;;  %v354_v53 = vpop.xlane.xlu1 %353 }
 0x1fc   :  { %v371_v54 = vmul.f32 0.0052083335, %v354_v53  ;;  %v1597_v6 = vmul.f32 0.0052083335, %v218_v50 }
 0x1fd   :  { %847 = vst.msk [vmem:[#allocation17 + $0x24] sm:$0xf] %vm571_vm8, %v844_v49 }
 0x1fe   :  { %v375_v55 = vmul.f32 %v371_v54, %v371_v54  ;;  %v381_v13 = vsub.f32 %v1547_v62, %v371_v54  ;;  %v382_v16 = vsub.f32 %v1545_v61, %v371_v54  ;;  %v236_v19 = vmul.f32 %v1597_v6, %v1597_v6 }
 0x1ff   :  { %v421_v62 = vperm.slane %v1605_v15, 0  ;;  %v422_v61 = vperm.slane %v1605_v15, 1 }
 0x203   :  { %v214_v56 = vpop.xlane.xlu2 %213  ;;  %v366_v51 = vpop.xlane.xlu0 %365 }
 0x204   :  { %v373_v57 = vmul.f32 0.0052083335, %v366_v51  ;;  %v1593_v60 = vmul.f32 0.0052083335, %v214_v56 }
 0x206   :  { %v377_v58 = vsub.f32 %v373_v57, %v375_v55  ;;  %v235_v2 = vmul.f32 %v1593_v60, %v1593_v60  ;;  %v208_v55 = vld [vmem:[#allocation7] sm:$0x3]  ;;  %v241_v57 = vsub.f32 %v1495_v30, %v1593_v60 }
 0x208   :  { %v379_v44 = vmax.f32 %v377_v58, 0.0 }
 0x20a   :  { %v385_v52 = vadd.f32 1e-05, %v379_v44 }
 0x20b   :  { %v358_v59 = vpop.xlane.xlu2 %357 }
 0x20c   :  { %1121 = vrsqrt.f32 %v385_v52  ;;  %vm393_vm10 = vweird.f32 %v385_v52  ;;  %v1614_v27 = vmul.f32 0.0052083335, %v358_v59  ;;  %v242_v59 = vsub.f32 %v1497_v35, %v1593_v60 }
 0x20e   :  { %v376_v39 = vmul.f32 %v1614_v27, %v1614_v27 }
 0x212   :  { %v1122_v63 = vpop.eup %1121 }
 0x213   :  { %v388_v0 = vmul.f32 %v1122_v63, %v385_v52  ;;  %v226_v1 = vpop.xlane.xlu2 %225  ;;  %vm394_vm9 = vweird.f32 %v1122_v63  ;;  %v209_v52 = vld [vmem:[%s1732_s3] sm:$0x3]  ;;  %s1394_s3 = smov [#allocation15]  }
 0x214   :  { %v233_v3 = vmul.f32 0.0052083335, %v226_v1  ;;  %vm395_vm11 = vmor %vm393_vm10, %vm394_vm9  ;;  %v282_v30 = vperm.slane %v209_v52, 1  ;;  %s929_s28 = sshll.u32 %s1394_s3, 4  ;;  %s930_s28 = int_to_ptr.vmem [resolvable:$true] %s929_s28 }
 0x215   :  { %v389_v4 = vmul.f32 %v1122_v63, %v388_v0  ;;  %v273_v0 = vperm.slane %v208_v55, 1 }
 0x216   :  { %v237_v5 = vsub.f32 %v233_v3, %v235_v2 }
 0x217   :  { %v390_v7 = vmul.f32 0.5, %v389_v4  ;;  %v281_v4 = vperm.slane %v209_v52, 0 }
 0x218   :  { %v239_v8 = vmax.f32 %v237_v5, 0.0 }
 0x219   :  { %v391_v10 = vsub.f32 1.5, %v390_v7 }
 0x21a   :  { %v245_v14 = vadd.f32 1e-05, %v239_v8 }
 0x21b   :  { %v392_v17 = vmul.f32 %v1122_v63, %v391_v10  ;;  %v230_v18 = vpop.xlane.xlu2 %229 }
 0x21c   :  { %1123 = vrsqrt.f32 %v245_v14  ;;  %v234_v20 = vmul.f32 0.0052083335, %v230_v18  ;;  %vm253_vm13 = vweird.f32 %v245_v14  ;;  %v243_v18 = vsub.f32 %v1499_v41, %v1597_v6 }
 0x21d   :  { %v396_v23 = vsel %vm395_vm11, %v1122_v63, %v392_v17  ;;  %v272_v63 = vperm.slane %v208_v55, 0 }
 0x21e   :  { %v407_v24 = vmul.f32 %v396_v23, %v381_v13  ;;  %v238_v25 = vsub.f32 %v234_v20, %v236_v19  ;;  %v408_v26 = vmul.f32 %v396_v23, %v382_v16  ;;  %v244_v19 = vsub.f32 %v1501_v42, %v1597_v6 }
 0x220   :  { %v240_v28 = vmax.f32 %v238_v25, 0.0  ;;  %v416_v29 = vmul.f32 %v412_v21, %v407_v24  ;;  %v417_v31 = vmul.f32 %v413_v22, %v408_v26 }
 0x222   :  { %v1124_v32 = vpop.eup %1123  ;;  %v246_v33 = vadd.f32 1e-05, %v240_v28  ;;  %v425_v34 = vadd.f32 %v421_v62, %v416_v29  ;;  %v426_v36 = vadd.f32 %v422_v61, %v417_v31 }
 0x223   :  { %v248_v37 = vmul.f32 %v1124_v32, %v245_v14  ;;  %v370_v38 = vpop.xlane.xlu2 %369  ;;  %vm254_vm12 = vweird.f32 %v1124_v32 }
 0x224   :  { %1125 = vrsqrt.f32 %v246_v33  ;;  %v374_v40 = vmul.f32 0.0052083335, %v370_v38  ;;  %v429_v43 = vmax.f32 %v425_v34, 0.0  ;;  %v430_v46 = vmax.f32 %v426_v36, 0.0  ;;  %vm255_vm14 = vmor %vm253_vm13, %vm254_vm12 }
 0x225   :  { %v249_v45 = vmul.f32 %v1124_v32, %v248_v37  ;;  %vm263_vm0 = vweird.f32 %v246_v33 }
 0x226   :  { %v378_v47 = vsub.f32 %v374_v40, %v376_v39  ;;  %v574_v48 = vpack.c.bf16 %v429_v43, %v429_v43  ;;  %v1626_v50 = vpack.c.bf16 %v430_v46, %v430_v46  ;;  %v383_v39 = vsub.f32 %v1565_v12, %v1614_v27 }
 0x227   :  { %v250_v49 = vmul.f32 0.5, %v249_v45  ;;  %v384_v40 = vsub.f32 %v1563_v9, %v1614_v27 }
 0x228   :  { %v380_v53 = vmax.f32 %v378_v47, 0.0  ;;  %689 = vrot.lane.b32.xlu2 %v574_v48, %s1390_s17  ;;  %576 = vst.msk [vmem:[#allocation15] sm:$0xf] %vm571_vm8, %v574_v48  ;;  %629 = vrot.lane.b32.xlu1 %v574_v48, %s1393_s9 }
 0x229   :  { %v251_v54 = vsub.f32 1.5, %v250_v49  ;;  %806 = vst.msk [vmem:[#allocation15 + $0x20] sm:$0xf] %vm571_vm8, %v1626_v50 }
 0x22a   :  { %v1126_v56 = vpop.eup %1125  ;;  %v386_v51 = vadd.f32 1e-05, %v380_v53 }
 0x22b   :  { %v252_v58 = vmul.f32 %v1124_v32, %v251_v54  ;;  %v258_v44 = vmul.f32 %v1126_v56, %v246_v33  ;;  %vm264_vm15 = vweird.f32 %v1126_v56 }
 0x22c   :  { %1127 = vrsqrt.f32 %v386_v51  ;;  %vm265_vm1 = vmor %vm263_vm0, %vm264_vm15  ;;  %vm403_vm3 = vweird.f32 %v386_v51 }
 0x22d   :  { %v256_v1 = vsel %vm255_vm14, %v1124_v32, %v252_v58  ;;  %v259_v2 = vmul.f32 %v1126_v56, %v258_v44 }
 0x22e   :  { %v267_v3 = vmul.f32 %v256_v1, %v241_v57  ;;  %v268_v5 = vmul.f32 %v256_v1, %v242_v59 }
 0x22f   :  { %v260_v7 = vmul.f32 0.5, %v259_v2 }
 0x230   :  { %748 = vrot.lane.b32.xlu1 %v574_v48, %s1392_s8  ;;  %v276_v8 = vmul.f32 %v272_v63, %v267_v3  ;;  %v277_v10 = vmul.f32 %v273_v0, %v268_v5 }
 0x231   :  { %v261_v13 = vsub.f32 1.5, %v260_v7 }
 0x232   :  { %v1128_v14 = vpop.eup %1127  ;;  %v285_v16 = vadd.f32 %v281_v4, %v276_v8  ;;  %v286_v35 = vadd.f32 %v282_v30, %v277_v10 }
 0x233   :  { %v262_v60 = vmul.f32 %v1126_v56, %v261_v13  ;;  %v398_v17 = vmul.f32 %v1128_v14, %v386_v51  ;;  %vm404_vm2 = vweird.f32 %v1128_v14 }
 0x234   :  { %v289_v20 = vmax.f32 %v285_v16, 0.0  ;;  %v290_v23 = vmax.f32 %v286_v35, 0.0  ;;  %vm405_vm4 = vmor %vm403_vm3, %vm404_vm2 }
 0x235   :  { %v266_v24 = vsel %vm265_vm1, %v1126_v56, %v262_v60  ;;  %v399_v25 = vmul.f32 %v1128_v14, %v398_v17 }
 0x236   :  { %v269_v26 = vmul.f32 %v266_v24, %v243_v18  ;;  %v293_v28 = vmul.f32 0.17677669, %v289_v20  ;;  %v294_v29 = vmul.f32 0.17677669, %v290_v23  ;;  %v270_v31 = vmul.f32 %v266_v24, %v244_v19 }
 0x237   :  { %v400_v32 = vmul.f32 0.5, %v399_v25 }
 0x238   :  { %v1645_v34 = vpack.c.bf16 %v293_v28, %v293_v28  ;;  %v278_v33 = vmul.f32 %v272_v63, %v269_v26  ;;  %v1647_v36 = vpack.c.bf16 %v294_v29, %v294_v29  ;;  %v279_v37 = vmul.f32 %v273_v0, %v270_v31 }
 0x239   :  { %v401_v41 = vsub.f32 1.5, %v400_v32 }
 0x23a   :  { %572 = vst.msk [vmem:[#allocation14] sm:$0xf] %vm571_vm8, %v1645_v34  ;;  %v287_v42 = vadd.f32 %v281_v4, %v278_v33  ;;  %v288_v6 = vadd.f32 %v282_v30, %v279_v37 }
 0x23b   :  { %v402_v38 = vmul.f32 %v1128_v14, %v401_v41  ;;  %801 = vst.msk [vmem:[#allocation14 + $0x20] sm:$0xf] %vm571_vm8, %v1647_v36 }
 0x23c   :  { %v291_v43 = vmax.f32 %v287_v42, 0.0  ;;  %v292_v45 = vmax.f32 %v288_v6, 0.0 }
 0x23d   :  { %v406_v46 = vsel %vm405_vm4, %v1128_v14, %v402_v38  ;;  %v670_v47 = vpop.f32.mrf.mxu3 }
 0x23e   :  { %v409_v48 = vmul.f32 %v406_v46, %v383_v39  ;;  %v675_v49 = vpack.c.bf16 %v670_v47, %v670_v47  ;;  %v410_v53 = vmul.f32 %v406_v46, %v384_v40  ;;  %v295_v54 = vmul.f32 0.17677669, %v291_v43 }
 0x23f   :  { %v296_v55 = vmul.f32 0.17677669, %v292_v45 }
 0x240   :  { %678 = vst.msk [vmem:[#allocation17 + $0x8] sm:$0xf] %vm571_vm8, %v675_v49  ;;  %v418_v56 = vmul.f32 %v412_v21, %v409_v48  ;;  %v419_v12 = vmul.f32 %v413_v22, %v410_v53  ;;  %v570_v51 = vpack.c.bf16 %v295_v54, %v295_v54 }
 0x241   :  { %v799_v9 = vpack.c.bf16 %v296_v55, %v296_v55 }
 0x242   :  { %v427_v27 = vadd.f32 %v421_v62, %v418_v56  ;;  %v428_v57 = vadd.f32 %v422_v61, %v419_v12  ;;  %573 = vst.msk [vmem:[#allocation14 + $0x4] sm:$0xf] %vm571_vm8, %v570_v51 }
 0x243   :  { %802 = vst.msk [vmem:[#allocation14 + $0x24] sm:$0xf] %vm571_vm8, %v799_v9 }
 0x244   :  { %v431_v58 = vmax.f32 %v427_v27, 0.0  ;;  %v432_v44 = vmax.f32 %v428_v57, 0.0 }
 0x245   :  { %v672_v52 = vpop.f32.mrf.mxu3 }
 0x246   :  { %v676_v59 = vpack.c.bf16 %v672_v52, %v672_v52  ;;  %v575_v21 = vpack.c.bf16 %v431_v58, %v431_v58  ;;  %v804_v63 = vpack.c.bf16 %v432_v44, %v432_v44 }
 0x248   :  { %679 = vst.msk [vmem:[#allocation17 + $0xc] sm:$0xf] %vm571_vm8, %v676_v59  ;;  %631 = vrot.lane.b32.xlu0 %v575_v21, %s1393_s9  ;;  %750 = vrot.lane.b32.xlu2 %v575_v21, %s1392_s8 }
 0x249   :  { %577 = vst.msk [vmem:[#allocation15 + $0x4] sm:$0xf] %vm571_vm8, %v575_v21  ;;  %863 = vrot.lane.b32.xlu1 %v804_v63, %s1393_s9 }
 0x24a   :  { %807 = vst.msk [vmem:[#allocation15 + $0x24] sm:$0xf] %vm571_vm8, %v804_v63 }
 0x24d   :  { %v902_v11 = vpop.f32.mrf.mxu3 }
 0x24e   :  { %v907_v15 = vpack.c.bf16 %v902_v11, %v902_v11  ;;  %v729_v22 = vpop.f32.mrf.mxu0  ;;  %v788_v62 = vpop.f32.mrf.mxu1 }
 0x24f   :  { %v734_v61 = vpack.c.bf16 %v729_v22, %v729_v22  ;;  %v793_v0 = vpack.c.bf16 %v788_v62, %v788_v62 }
 0x250   :  { %910 = vst.msk [vmem:[#allocation17 + $0x28] sm:$0xf] %vm571_vm8, %v907_v15  ;;  %691 = vrot.lane.b32.xlu0 %v575_v21, %s1390_s17  ;;  %618 = vrot.lane.b32.xlu2 %v1645_v34, %s1393_s9 }
 0x251   :  { %737 = vst.msk [vmem:[#allocation17 + $0x10] sm:$0xf] %vm571_vm8, %v734_v61  ;;  %680 = vrot.lane.b32.xlu1 %v1645_v34, %s1390_s17 }
 0x252   :  { %796 = vst.msk [vmem:[#allocation17 + $0x18] sm:$0xf] %vm571_vm8, %v793_v0 }
 0x255   :  { %v904_v1 = vpop.f32.mrf.mxu3 }
 0x256   :  { %v908_v2 = vpack.c.bf16 %v904_v1, %v904_v1  ;;  %v731_v3 = vpop.f32.mrf.mxu0  ;;  %v790_v4 = vpop.f32.mrf.mxu1 }
 0x257   :  { %v735_v5 = vpack.c.bf16 %v731_v3, %v731_v3  ;;  %v794_v30 = vpack.c.bf16 %v790_v4, %v790_v4 }
 0x258   :  { %911 = vst.msk [vmem:[#allocation17 + $0x2c] sm:$0xf] %vm571_vm8, %v908_v2  ;;  %861 = vrot.lane.b32.xlu0 %v1626_v50, %s1393_s9  ;;  %682 = vrot.lane.b32.xlu2 %v570_v51, %s1390_s17 }
 0x259   :  { %738 = vst.msk [vmem:[#allocation17 + $0x14] sm:$0xf] %vm571_vm8, %v735_v5  ;;  %741 = vrot.lane.b32.xlu1 %v570_v51, %s1392_s8 }
 0x25a   :  { %797 = vst.msk [vmem:[#allocation17 + $0x1c] sm:$0xf] %vm571_vm8, %v794_v30 }
 0x260   :  { %620 = vrot.lane.b32.xlu0 %v570_v51, %s1393_s9  ;;  %850 = vrot.lane.b32.xlu2 %v1647_v36, %s1393_s9 }
 0x268   :  { %739 = vrot.lane.b32.xlu0 %v1645_v34, %s1392_s8 }
 0x270   :  { %852 = vrot.lane.b32.xlu0 %v799_v9, %s1393_s9 }
 0x282   :  { %v690_v7 = vpop.permute.xlu2 %689 }
 0x283   :  { %696 = vst.msk [vmem:[#allocation15 + $0x10] sm:$0xf] %vm571_vm8, %v690_v7 }
 0x29a   :  { %v630_v50 = vpop.permute.xlu1 %629 }
 0x29b   :  { %636 = vst.msk [vmem:[#allocation15 + $0x8] sm:$0xf] %vm571_vm8, %v630_v50 }
 0x2a2   :  { %v751_v8 = vpop.permute.xlu2 %750  ;;  %v749_v10 = vpop.permute.xlu1 %748 }
 0x2a3   :  { %756 = vst.msk [vmem:[#allocation15 + $0x1c] sm:$0xf] %vm571_vm8, %v751_v8 }
 0x2a4   :  { %755 = vst.msk [vmem:[#allocation15 + $0x18] sm:$0xf] %vm571_vm8, %v749_v10 }
 0x2aa   :  { %v619_v13 = vpop.permute.xlu2 %618 }
 0x2ab   :  { %625 = vst.msk [vmem:[#allocation14 + $0x8] sm:$0xf] %vm571_vm8, %v619_v13 }
 0x2b2   :  { %v683_v14 = vpop.permute.xlu2 %682 }
 0x2b3   :  { %688 = vst.msk [vmem:[#allocation14 + $0x14] sm:$0xf] %vm571_vm8, %v683_v14 }
 0x2ba   :  { %v851_v16 = vpop.permute.xlu2 %850  ;;  %v632_v35 = vpop.permute.xlu0 %631 }
 0x2bb   :  { %857 = vst.msk [vmem:[#allocation14 + $0x28] sm:$0xf] %vm571_vm8, %v851_v16  ;;  %v864_v60 = vpop.permute.xlu1 %863 }
 0x2bc   :  { %869 = vst.msk [vmem:[#allocation15 + $0x2c] sm:$0xf] %vm571_vm8, %v864_v60 }
 0x2bd   :  { %637 = vst.msk [vmem:[#allocation15 + $0xc] sm:$0xf] %vm571_vm8, %v632_v35 }
 0x2c2   :  { %v692_v17 = vpop.permute.xlu0 %691 }
 0x2c3   :  { %v681_v18 = vpop.permute.xlu1 %680  ;;  %697 = vst.msk [vmem:[#allocation15 + $0x14] sm:$0xf] %vm571_vm8, %v692_v17 }
 0x2c4   :  { %687 = vst.msk [vmem:[#allocation14 + $0x10] sm:$0xf] %vm571_vm8, %v681_v18 }
 0x2ca   :  { %v862_v19 = vpop.permute.xlu0 %861 }
 0x2cb   :  { %v742_v20 = vpop.permute.xlu1 %741  ;;  %868 = vst.msk [vmem:[#allocation15 + $0x28] sm:$0xf] %vm571_vm8, %v862_v19 }
 0x2cc   :  { %747 = vst.msk [vmem:[#allocation14 + $0x1c] sm:$0xf] %vm571_vm8, %v742_v20  ;;  %937 = dma.vmem_to_hbm [thread:$0]  %s930_s28, 768, %s932_s7, [#allocation16], %s1390_s17, %s1390_s17, %s1391_s23  }
 0x2cd   :  { %950 = dma.vmem_to_hbm [thread:$0]  %s943_s15, 768, %s945_s19, [#allocation16], %s1390_s17, %s1390_s17, %s1391_s23  }
 0x2d2   :  { %v621_v23 = vpop.permute.xlu0 %620 }
 0x2d3   :  { %626 = vst.msk [vmem:[#allocation14 + $0xc] sm:$0xf] %vm571_vm8, %v621_v23 }
 0x2da   :  { %v740_v24 = vpop.permute.xlu0 %739 }
 0x2db   :  { %746 = vst.msk [vmem:[#allocation14 + $0x18] sm:$0xf] %vm571_vm8, %v740_v24 }
 0x2e2   :  { %v853_v25 = vpop.permute.xlu0 %852 }
 0x2e3   :  { %858 = vst.msk [vmem:[#allocation14 + $0x2c] sm:$0xf] %vm571_vm8, %v853_v25 }
 0x2e4   :  { %924 = dma.vmem_to_hbm [thread:$0]  %s917_s13, 768, %s919_s22, [#allocation4], %s1390_s17, %s1390_s17, %s1391_s23  }
 0x2e5   :  { %1377 = dma.done.wait [#allocation4], 768  }
 0x2e6   :  { %1378 = vsyncadd [#allocation4], 4294966528 }
 0x2e7   :  { %1379 = dma.done.wait [#allocation16], 1536  }
 0x2e8   :  { %1380 = vsyncadd [#allocation16], 4294965760 }
 0x2e9   :  { %963 = vsyncpa [#allocation3], 1 }
 0x2ea   :  { %964 = vsyncpa [#allocation6], 1 }
 0x2eb   :  { %965 = vsyncpa [#allocation9], 1 }
 0x2ec   :  { %966 = vsyncpa [#allocation12], 1 }
 0x2ed   :  { %967 = vsyncpa [#allocation4], 1 }
 0x2ee   :  { %968 = vsyncpa [#allocation16], 1 }

</bundles_post_ra>
